<compile_context>
chip_gen: v7x
topology: tpu7x:2x2x1
jax: 0.10.0
libtpu: 0.0.40
codegen_flags: <defaults>
</compile_context>

<pallas_src>
import jax
import jax.numpy as jnp
from jax.experimental import pallas as pl
from jax.experimental.pallas import tpu as pltpu


def mlp_kernel(x_ref, w1_ref, b1_ref, w2_ref, b2_ref, o_ref):
    # fc1 (packed): [TR, pack*D_in] @ [pack*D_in, pack*H] + [1, pack*H], ReLU.
    h = jnp.dot(x_ref[...], w1_ref[...], preferred_element_type=jnp.float32)
    h = jnp.maximum(h + b1_ref[...], 0.0)
    # fc2 (packed): [TR, pack*H] @ [pack*H, pack*D_out] + [1, pack*D_out].
    out = jnp.dot(h, w2_ref[...], preferred_element_type=jnp.float32) + b2_ref[...]
    o_ref[...] = out.astype(o_ref.dtype)   # single lane-dense store


def multilabel_classifier(x, w1, b1, w2, b2, *, pack=32, block_rows=1024):
    """Fused fc1 -> ReLU -> fc2.

    x : [B, D_in] f32
    w1: [D_in, H]  (PyTorch fc1.weight.T)   b1: [1, H]
    w2: [H, D_out] (PyTorch fc2.weight.T)   b2: [1, D_out]
    returns [B, D_out] f32
    """
    B, D_in = x.shape
    H = w1.shape[1]
    D_out = w2.shape[1]

    # ---- wrapper-side sample packing (layout plumbing, done once) ----------
    B_pad = ((B + pack - 1) // pack) * pack
    if B_pad != B:
        x = jnp.pad(x, ((0, B_pad - B), (0, 0)))
    R = B_pad // pack                                   # packed rows
    xp = x.reshape(R, pack * D_in)                      # row-major: pack samples / row

    eye = jnp.eye(pack, dtype=jnp.float32)
    w1_bd = jnp.kron(eye, w1.astype(jnp.float32))       # [pack*D_in, pack*H] block-diag
    w2_bd = jnp.kron(eye, w2.astype(jnp.float32))       # [pack*H, pack*D_out] block-diag
    b1_bd = jnp.tile(b1.astype(jnp.float32), (1, pack)) # [1, pack*H]
    b2_bd = jnp.tile(b2.astype(jnp.float32), (1, pack)) # [1, pack*D_out]

    PK, PH, PO = pack * D_in, pack * H, pack * D_out

    # ---- batch-only tiling (cdiv grid: no non-divisible-batch cliff) -------
    if R > block_rows:
        tr = block_rows                           # big problem: ~2 MiB x tile, many steps
    elif R >= 32:
        tr = max(8, (R // 4) // 8 * 8)            # a few steps: pipelining + dual-TC split
    else:
        tr = R                                    # tiny batch: one whole-array block
    grid = (pl.cdiv(R, tr),)                      # ragged last tile is safe (no row reduction)

    flops = 2 * R * (PK * PH + PH * PO)
    bytes_accessed = 4 * (R * PK + PK * PH + PH + PH * PO + PO + R * PO)
    cost = pl.CostEstimate(flops=flops, transcendentals=0,
                           bytes_accessed=bytes_accessed)

    out_packed = pl.pallas_call(
        mlp_kernel,
        out_shape=jax.ShapeDtypeStruct((R, PO), jnp.float32),
        grid=grid,
        in_specs=[
            pl.BlockSpec((tr, PK), lambda i: (i, 0)),   # packed x tile, pipelined
            pl.BlockSpec((PK, PH), lambda i: (0, 0)),   # w1_bd resident in VMEM
            pl.BlockSpec((1, PH), lambda i: (0, 0)),    # b1 resident
            pl.BlockSpec((PH, PO), lambda i: (0, 0)),   # w2_bd resident
            pl.BlockSpec((1, PO), lambda i: (0, 0)),    # b2 resident
        ],
        out_specs=pl.BlockSpec((tr, PO), lambda i: (i, 0)),
        compiler_params=pltpu.CompilerParams(
            dimension_semantics=("parallel",)),         # dual-TC split on v7x
        cost_estimate=cost,
    )(xp, w1_bd, b1_bd, w2_bd, b2_bd)

    # Unpack: [R, pack*D_out] -> [B_pad, D_out] -> [B, D_out] (free, row-major).
    return out_packed.reshape(B_pad, D_out)[:B]


if __name__ == "__main__":
    # Shapes consistent with the module: hidden_dim = 20.
    input_dim, hidden_dim, output_dim = 16, 20, 4

    key = jax.random.PRNGKey(0)
    kx, kw1, kb1, kw2, kb2, kx2, kx3 = jax.random.split(key, 7)

    # Deterministic init mimicking nn.Linear's uniform(-1/sqrt(fan_in), ...).
    bound1 = 1.0 / (input_dim ** 0.5)
    w1 = jax.random.uniform(kw1, (input_dim, hidden_dim),
                            minval=-bound1, maxval=bound1, dtype=jnp.float32)
    b1 = jax.random.uniform(kb1, (1, hidden_dim),
                            minval=-bound1, maxval=bound1, dtype=jnp.float32)
    bound2 = 1.0 / (hidden_dim ** 0.5)
    w2 = jax.random.uniform(kw2, (hidden_dim, output_dim),
                            minval=-bound2, maxval=bound2, dtype=jnp.float32)
    b2 = jax.random.uniform(kb2, (1, output_dim),
                            minval=-bound2, maxval=bound2, dtype=jnp.float32)

    def reference(x):
        return jnp.maximum(x @ w1 + b1, 0.0) @ w2 + b2

    # 1) Tiny batch (B < pack): exercises pad-to-pack path, single block.
    x_small = jax.random.normal(kx, (8, input_dim), dtype=jnp.float32)
    out_small = jax.block_until_ready(multilabel_classifier(x_small, w1, b1, w2, b2))
    assert out_small.shape == (8, output_dim)
    assert jnp.allclose(out_small, reference(x_small), atol=1e-5, rtol=1e-5)

    # 2) Divisible batch: multi-step "parallel" grid, 128-lane-dense output stores.
    x_mid = jax.random.normal(kx2, (1024, input_dim), dtype=jnp.float32)
    out_mid = jax.block_until_ready(multilabel_classifier(x_mid, w1, b1, w2, b2))
    assert out_mid.shape == (1024, output_dim)
    assert jnp.allclose(out_mid, reference(x_mid), atol=1e-5, rtol=1e-5)

    # 3) Non-divisible batch: pad-to-pack + ragged last grid step via cdiv grid.
    x_odd = jax.random.normal(kx3, (2600, input_dim), dtype=jnp.float32)
    out_odd = jax.block_until_ready(multilabel_classifier(x_odd, w1, b1, w2, b2))
    assert out_odd.shape == (2600, output_dim)
    assert jnp.allclose(out_odd, reference(x_odd), atol=1e-5, rtol=1e-5)

    print("KERNEL_OK")
</pallas_src>

<mosaic_0001>
module attributes {stable_mosaic.version = 11 : i64} {
  func.func @mlp_kernel(%arg0: i32, %arg1: memref<1x512xf32, #tpu.memory_space<vmem>>, %arg2: memref<512x640xf32, #tpu.memory_space<vmem>>, %arg3: memref<1x640xf32, #tpu.memory_space<vmem>>, %arg4: memref<640x128xf32, #tpu.memory_space<vmem>>, %arg5: memref<1x128xf32, #tpu.memory_space<vmem>>, %arg6: memref<1x128xf32, #tpu.memory_space<vmem>>) attributes {dimension_semantics = [#tpu.dimension_semantics<parallel>], iteration_bounds = array<i64: 1>, scalar_prefetch = 0 : i64, scratch_operands = 0 : i64, tpu.core_type = #tpu.core_type<tc>, window_params = [{transform_indices = @transform_0, window_bounds = array<i64: 1, 512>}, {pipeline_mode = #tpu.pipeline_mode<synchronous>, transform_indices = @transform_1, window_bounds = array<i64: 512, 640>}, {pipeline_mode = #tpu.pipeline_mode<synchronous>, transform_indices = @transform_2, window_bounds = array<i64: 1, 640>}, {pipeline_mode = #tpu.pipeline_mode<synchronous>, transform_indices = @transform_3, window_bounds = array<i64: 640, 128>}, {pipeline_mode = #tpu.pipeline_mode<synchronous>, transform_indices = @transform_4, window_bounds = array<i64: 1, 128>}, {transform_indices = @transform_5, window_bounds = array<i64: 1, 128>}]} {
    %c0 = arith.constant 0 : index
    %c0_0 = arith.constant 0 : index
    %0 = vector.load %arg1[%c0, %c0_0] : memref<1x512xf32, #tpu.memory_space<vmem>>, vector<1x512xf32>
    %c0_1 = arith.constant 0 : index
    %c0_2 = arith.constant 0 : index
    %1 = vector.load %arg2[%c0_1, %c0_2] : memref<512x640xf32, #tpu.memory_space<vmem>>, vector<512x640xf32>
    %cst = arith.constant dense<0.000000e+00> : vector<1x640xf32>
    %2 = tpu.matmul %0, %1, %cst {dimension_numbers = #tpu.dot_dimension_numbers<[1], [0], [0], [1], [0, 0, 1, 1], [], []>} : vector<1x512xf32>, vector<512x640xf32>, vector<1x640xf32> -> vector<1x640xf32>
    %c0_3 = arith.constant 0 : index
    %c0_4 = arith.constant 0 : index
    %3 = vector.load %arg3[%c0_3, %c0_4] : memref<1x640xf32, #tpu.memory_space<vmem>>, vector<1x640xf32>
    %4 = arith.addf %2, %3 : vector<1x640xf32>
    %cst_5 = arith.constant 0.000000e+00 : f32
    %5 = vector.broadcast %cst_5 : f32 to vector<1x640xf32>
    %6 = arith.maximumf %4, %5 : vector<1x640xf32>
    %c0_6 = arith.constant 0 : index
    %c0_7 = arith.constant 0 : index
    %7 = vector.load %arg4[%c0_6, %c0_7] : memref<640x128xf32, #tpu.memory_space<vmem>>, vector<640x128xf32>
    %cst_8 = arith.constant dense<0.000000e+00> : vector<1x128xf32>
    %8 = tpu.matmul %6, %7, %cst_8 {dimension_numbers = #tpu.dot_dimension_numbers<[1], [0], [0], [1], [0, 0, 1, 1], [], []>} : vector<1x640xf32>, vector<640x128xf32>, vector<1x128xf32> -> vector<1x128xf32>
    %c0_9 = arith.constant 0 : index
    %c0_10 = arith.constant 0 : index
    %9 = vector.load %arg5[%c0_9, %c0_10] : memref<1x128xf32, #tpu.memory_space<vmem>>, vector<1x128xf32>
    %10 = arith.addf %8, %9 : vector<1x128xf32>
    %c0_11 = arith.constant 0 : index
    %c0_12 = arith.constant 0 : index
    %11 = vector.load %arg6[%c0_11, %c0_12] : memref<1x128xf32, #tpu.memory_space<vmem>>, vector<1x128xf32>
    tpu.vector_store %arg6[%c0_11, %c0_12], %10 {strides = array<i32>} : memref<1x128xf32, #tpu.memory_space<vmem>>, vector<1x128xf32>,
    return
  }
  func.func @transform_0(%arg0: i32) -> (i32, i32) {
    %c0_i32 = arith.constant 0 : i32
    %c0_i32_0 = arith.constant 0 : i32
    return %arg0, %c0_i32 : i32, i32
  }
  func.func @transform_1(%arg0: i32) -> (i32, i32) {
    %c0_i32 = arith.constant 0 : i32
    %c0_i32_0 = arith.constant 0 : i32
    %c0_i32_1 = arith.constant 0 : i32
    return %c0_i32, %c0_i32_0 : i32, i32
  }
  func.func @transform_2(%arg0: i32) -> (i32, i32) {
    %c0_i32 = arith.constant 0 : i32
    %c0_i32_0 = arith.constant 0 : i32
    %c0_i32_1 = arith.constant 0 : i32
    return %c0_i32, %c0_i32_0 : i32, i32
  }
  func.func @transform_3(%arg0: i32) -> (i32, i32) {
    %c0_i32 = arith.constant 0 : i32
    %c0_i32_0 = arith.constant 0 : i32
    %c0_i32_1 = arith.constant 0 : i32
    return %c0_i32, %c0_i32_0 : i32, i32
  }
  func.func @transform_4(%arg0: i32) -> (i32, i32) {
    %c0_i32 = arith.constant 0 : i32
    %c0_i32_0 = arith.constant 0 : i32
    %c0_i32_1 = arith.constant 0 : i32
    return %c0_i32, %c0_i32_0 : i32, i32
  }
  func.func @transform_5(%arg0: i32) -> (i32, i32) {
    %c0_i32 = arith.constant 0 : i32
    %c0_i32_0 = arith.constant 0 : i32
    return %arg0, %c0_i32 : i32, i32
  }
}

</mosaic_0001>

<bundles_post_ra>
// kernel: tpu_custom_call.1
= control target key start
LH: loop header
LB: loop body
LE: loop exit
PB: predicated region body
PF: predicated region fallthrough
CT: control target
= control target key end

     0   :  { %10 = vsyncpa [#allocation3], 0  ;;  %s2123_s0 = inlined_call_operand.hbm [shape: f32[1,512], index: 0, kind: input, shape index: {}]   ;;  %s2124_s1 = inlined_call_operand.hbm [shape: f32[512,640], index: 1, kind: input, shape index: {}]   ;;  %s2125_s2 = inlined_call_operand.hbm [shape: f32[1,640], index: 2, kind: input, shape index: {}]   ;;  %s2126_s3 = inlined_call_operand.hbm [shape: f32[640,128], index: 3, kind: input, shape index: {}]   ;;  %s2127_s4 = inlined_call_operand.hbm [shape: f32[1,128], index: 4, kind: input, shape index: {}]   ;;  %s2128_s5 = inlined_call_operand.hbm [shape: f32[1,128], index: 5, kind: output, shape index: {}]  }
   0x1   :  { %11 = vsyncpa [#allocation6], 0 }
   0x2   :  { %12 = vsyncpa [#allocation9], 0 }
   0x3   :  { %13 = vsyncpa [#allocation4], 0  ;;  %s1951_s18 = smov [#allocation5]   ;;  %s1811_s22 = scalar_lea.hbm %s2124_s1, 40960 }
   0x4   :  { %s29_s19 = sshll.u32 %s1951_s18, 4  ;;  %p1812_p0 = scmp.ne.s32.totalorder %s2124_s1, %s1811_s22  ;;  %s30_s19 = int_to_ptr.vmem [resolvable:$true] %s29_s19 }
   0x5   :  { %p1815_p1 = scmp.lt.u32.totalorder %s1811_s22, %s2124_s1 }
   0x7   :  { %p1817_p2 = pnand %p1815_p1, %p1812_p0 }
   0x9   :  { %1820 = shalt.err (!%p1817_p2)
}
   0xa   :  { %s1821_s27 = scalar_lea.vmem %s30_s19, 40960  ;;  %p1826_p4 = scmp.lt.s32.totalorder %s30_s19, %s30_s19 }
   0xb   :  { %p1822_p3 = scmp.ne.s32.totalorder %s30_s19, %s1821_s27  ;;  %p1827_p5 = scmp.lt.s32.totalorder %s1821_s27, %s1821_s27 }
   0xd   :  { %p1828_p6 = por %p1827_p5, %p1826_p4 }
   0xf   :  { %p1829_p7 = pnand %p1828_p6, %p1822_p3 }
  0x11   :  { %1832 = shalt.err (!%p1829_p7)
}
  0x12   :  { %s1952_s28 = smov 640   ;;  %s1953_s29 = smov 40  }
  0x13   :  { %35 = dma.hbm_to_vmem [thread:$0]  %s2124_s1, 40960, %s30_s19, [#allocation6], %s1952_s28, %s1952_s28, %s1953_s29  }
  0x14   :  { %s1954_s7 = smov [#allocation8]   ;;  %s1833_s11 = scalar_lea.hbm %s2126_s3, 10240 }
  0x15   :  { %s51_s8 = sshll.u32 %s1954_s7, 4  ;;  %p1834_p8 = scmp.ne.s32.totalorder %s2126_s3, %s1833_s11  ;;  %s52_s8 = int_to_ptr.vmem [resolvable:$true] %s51_s8 }
  0x16   :  { %p1837_p9 = scmp.lt.u32.totalorder %s1833_s11, %s2126_s3 }
  0x18   :  { %p1839_p10 = pnand %p1837_p9, %p1834_p8 }
  0x1a   :  { %1842 = shalt.err (!%p1839_p10)
}
  0x1b   :  { %s1843_s16 = scalar_lea.vmem %s52_s8, 10240  ;;  %p1848_p12 = scmp.lt.s32.totalorder %s52_s8, %s52_s8 }
  0x1c   :  { %p1844_p11 = scmp.ne.s32.totalorder %s52_s8, %s1843_s16  ;;  %p1849_p13 = scmp.lt.s32.totalorder %s1843_s16, %s1843_s16 }
  0x1e   :  { %p1850_p0 = por %p1849_p13, %p1848_p12 }
  0x20   :  { %p1851_p1 = pnand %p1850_p0, %p1844_p11 }
  0x22   :  { %1854 = shalt.err (!%p1851_p1)
}
  0x23   :  { %s1955_s1 = smov 128   ;;  %s1956_s17 = smov 8  }
  0x24   :  { %57 = dma.hbm_to_vmem [thread:$0]  %s2126_s3, 10240, %s52_s8, [#allocation9], %s1955_s1, %s1955_s1, %s1956_s17  }
  0x25   :  { %s1957_s20 = smov [#allocation2]   ;;  %s1958_s22 = smov [#allocation7]  }
  0x26   :  { %s20_s21 = sshll.u32 %s1957_s20, 4  ;;  %s42_s23 = sshll.u32 %s1958_s22, 4  ;;  %s21_s21 = int_to_ptr.vmem [resolvable:$true] %s20_s21  ;;  %s43_s23 = int_to_ptr.vmem [resolvable:$true] %s42_s23 }
  0x27   :  { %s1855_s26 = scalar_lea.hbm %s2123_s0, 64 }
  0x28   :  { %p1856_p2 = scmp.ne.s32.totalorder %s2123_s0, %s1855_s26  ;;  %p1859_p3 = scmp.lt.u32.totalorder %s1855_s26, %s2123_s0 }
  0x2a   :  { %p1861_p4 = pnand %p1859_p3, %p1856_p2 }
  0x2c   :  { %1864 = shalt.err (!%p1861_p4)
}
  0x2d   :  { %s1865_s3 = scalar_lea.vmem %s21_s21, 64  ;;  %p1870_p6 = scmp.lt.s32.totalorder %s21_s21, %s21_s21 }
  0x2e   :  { %p1866_p5 = scmp.ne.s32.totalorder %s21_s21, %s1865_s3  ;;  %p1871_p7 = scmp.lt.s32.totalorder %s1865_s3, %s1865_s3 }
  0x30   :  { %p1872_p8 = por %p1871_p7, %p1870_p6 }
  0x32   :  { %p1873_p9 = pnand %p1872_p8, %p1866_p5 }
  0x34   :  { %1876 = shalt.err (!%p1873_p9)
}
  0x35   :  { %23 = dma.hbm_to_vmem [thread:$0]  %s2123_s0, 64, %s21_s21, [#allocation3]  }
  0x36   :  { %s1877_s10 = scalar_lea.hbm %s2125_s2, 80 }
  0x37   :  { %p1878_p10 = scmp.ne.s32.totalorder %s2125_s2, %s1877_s10  ;;  %p1881_p11 = scmp.lt.u32.totalorder %s1877_s10, %s2125_s2 }
  0x39   :  { %p1883_p12 = pnand %p1881_p11, %p1878_p10 }
  0x3b   :  { %1886 = shalt.err (!%p1883_p12)
}
  0x3c   :  { %s1887_s15 = scalar_lea.vmem %s43_s23, 80  ;;  %s1891_s16 = scalar_lea.vmem %s43_s23, 96 }
  0x3d   :  { %p1888_p13 = scmp.ne.s32.totalorder %s43_s23, %s1887_s15  ;;  %p1892_p0 = scmp.lt.s32.totalorder %s43_s23, %s43_s23 }
  0x3e   :  { %p1893_p1 = scmp.lt.s32.totalorder %s1891_s16, %s1887_s15 }
  0x40   :  { %p1894_p2 = por %p1893_p1, %p1892_p0 }
  0x42   :  { %p1895_p3 = pnand %p1894_p2, %p1888_p13 }
  0x44   :  { %1898 = shalt.err (!%p1895_p3)
}
  0x45   :  { %45 = dma.hbm_to_vmem [thread:$0]  %s2125_s2, 80, %s43_s23, [#allocation6]  }
  0x46   :  { %s1959_s17 = smov [#allocation10]   ;;  %s1899_s21 = scalar_lea.hbm %s2127_s4, 16 }
  0x47   :  { %s64_s18 = sshll.u32 %s1959_s17, 4  ;;  %p1900_p4 = scmp.ne.s32.totalorder %s2127_s4, %s1899_s21  ;;  %s65_s18 = int_to_ptr.vmem [resolvable:$true] %s64_s18 }
  0x48   :  { %p1903_p5 = scmp.lt.u32.totalorder %s1899_s21, %s2127_s4 }
  0x4a   :  { %p1905_p6 = pnand %p1903_p5, %p1900_p4 }
  0x4c   :  { %1908 = shalt.err (!%p1905_p6)
}
  0x4d   :  { %s1909_s27 = scalar_lea.vmem %s65_s18, 16  ;;  %s1913_s2 = scalar_lea.vmem %s65_s18, 32 }
  0x4e   :  { %p1910_p7 = scmp.ne.s32.totalorder %s65_s18, %s1909_s27  ;;  %p1914_p8 = scmp.lt.s32.totalorder %s65_s18, %s65_s18 }
  0x4f   :  { %p1915_p9 = scmp.lt.s32.totalorder %s1913_s2, %s1909_s27 }
  0x51   :  { %p1916_p10 = por %p1915_p9, %p1914_p8 }
  0x53   :  { %p1917_p11 = pnand %p1916_p10, %p1910_p7 }
  0x55   :  { %1920 = shalt.err (!%p1917_p11)
}
  0x56   :  { %67 = dma.hbm_to_vmem [thread:$0]  %s2127_s4, 16, %s65_s18, [#allocation9]  }
  0x57   :  { %1943 = dma.done.wait [#allocation3], 64  }
  0x58   :  { %1944 = vsyncadd [#allocation3], 4294967232 }
  0x59   :  { %1945 = dma.done.wait [#allocation6], 41040  }
  0x5a   :  { %1946 = vsyncadd [#allocation6], 4294926256 }
  0x5b   :  { %1947 = dma.done.wait [#allocation9], 10256  }
  0x5c   :  { %1948 = vsyncadd [#allocation9], 4294957040  ;;  %v85_v0 = vld [vmem:[#allocation5 + $0x8] sm:$0xff]  ;;  %v90_v1 = vld [vmem:[#allocation5 + $0x30] sm:$0xff]  ;;  %vm1961_vm0 = vmmov 0   ;;  %s1963_s4 = smov [#allocation11]  }
  0x5d   :  { %v87_v2 = vld [vmem:[#allocation5 + $0x18] sm:$0xff]  ;;  %v1382_v3 = vpack.c.bf16 %v90_v1, %v85_v0  ;;  %v92_v4 = vld [vmem:[#allocation5 + $0x40] sm:$0xff]  ;;  %v89_v6 = vld [vmem:[#allocation5 + $0x28] sm:$0xff]  ;;  %s1179_s29 = sshll.u32 %s1963_s4, 4  ;;  %s1180_s29 = int_to_ptr.vmem [resolvable:$true] %s1179_s29 }
  0x5e   :  { %v84_v5 = vld [vmem:[#allocation5] sm:$0xff]  ;;  %v1510_v7 = vpack.c.bf16 %v92_v4, %v87_v2  ;;  %v86_v9 = vld [vmem:[#allocation5 + $0x10] sm:$0xff]  ;;  %v91_v10 = vld [vmem:[#allocation5 + $0x38] sm:$0xff]  ;;  %s1921_s30 = scalar_lea.vmem %s1180_s29, 16  ;;  %s1925_s3 = scalar_lea.vmem %s1180_s29, 32 }
  0x5f   :  { %v1384_v8 = vpack.c.bf16 %v89_v6, %v84_v5  ;;  %v95_v11 = vld [vmem:[#allocation5 + $0x58] sm:$0xff]  ;;  %1383 = vmatprep.subr.bf16.mxu0 %v1382_v3  ;;  %v1512_v12 = vpack.c.bf16 %v91_v10, %v86_v9  ;;  %v100_v13 = vld [vmem:[#allocation5 + $0x80] sm:$0xff]  ;;  %v97_v14 = vld [vmem:[#allocation5 + $0x68] sm:$0xff]  ;;  %p1922_p12 = scmp.ne.s32.totalorder %s1180_s29, %s1921_s30  ;;  %p1926_p13 = scmp.lt.s32.totalorder %s1180_s29, %s1180_s29 }
  0x60   :  { %v102_v15 = vld [vmem:[#allocation5 + $0x90] sm:$0xff]  ;;  %1511 = vmatprep.subr.bf16.mxu1 %v1510_v7  ;;  %v1386_v16 = vpack.c.bf16 %v100_v13, %v95_v11  ;;  %v99_v19 = vld [vmem:[#allocation5 + $0x78] sm:$0xff]  ;;  %v96_v20 = vld [vmem:[#allocation5 + $0x60] sm:$0xff]  ;;  %p1927_p0 = scmp.lt.s32.totalorder %s1925_s3, %s1921_s30 }
  0x61   :  { %1385 = vmatpush1.bf16.msra.mxu0 %v1384_v8  ;;  %v1514_v17 = vpack.c.bf16 %v102_v15, %v97_v14  ;;  %v94_v18 = vld [vmem:[#allocation5 + $0x50] sm:$0xff]  ;;  %1513 = vmatpush1.bf16.msra.mxu1 %v1512_v12  ;;  %v101_v22 = vld [vmem:[#allocation5 + $0x88] sm:$0xff]  ;;  %v107_v27 = vld [vmem:[#allocation5 + $0xb8] sm:$0xff] }
  0x62   :  { %v1388_v21 = vpack.c.bf16 %v99_v19, %v94_v18  ;;  %v105_v23 = vld [vmem:[#allocation5 + $0xa8] sm:$0xff]  ;;  %v110_v24 = vld [vmem:[#allocation5 + $0xd0] sm:$0xff]  ;;  %1387 = vmatprep.subr.bf16.mxu0 %v1386_v16  ;;  %v1516_v25 = vpack.c.bf16 %v101_v22, %v96_v20  ;;  %v112_v28 = vld [vmem:[#allocation5 + $0xe0] sm:$0xff]  ;;  %p1928_p1 = por %p1927_p0, %p1926_p13 }
  0x63   :  { %1515 = vmatprep.subr.bf16.mxu1 %v1514_v17  ;;  %v1390_v26 = vpack.c.bf16 %v110_v24, %v105_v23  ;;  %v104_v29 = vld [vmem:[#allocation5 + $0xa0] sm:$0xff]  ;;  %v1518_v30 = vpack.c.bf16 %v112_v28, %v107_v27  ;;  %v109_v31 = vld [vmem:[#allocation5 + $0xc8] sm:$0xff]  ;;  %v106_v32 = vld [vmem:[#allocation5 + $0xb0] sm:$0xff] }
  0x64   :  { %v111_v33 = vld [vmem:[#allocation5 + $0xd8] sm:$0xff]  ;;  %v1392_v34 = vpack.c.bf16 %v109_v31, %v104_v29  ;;  %v120_v36 = vld [vmem:[#allocation5 + $0x120] sm:$0xff]  ;;  %v117_v37 = vld [vmem:[#allocation5 + $0x108] sm:$0xff]  ;;  %p1929_p2 = pnand %p1928_p1, %p1922_p12 }
  0x65   :  { %1389 = vmatpush1.bf16.msra.mxu0 %v1388_v21  ;;  %v115_v35 = vld [vmem:[#allocation5 + $0xf8] sm:$0xff]  ;;  %1517 = vmatpush1.bf16.msra.mxu1 %v1516_v25  ;;  %v1520_v38 = vpack.c.bf16 %v111_v33, %v106_v32  ;;  %v122_v40 = vld [vmem:[#allocation5 + $0x130] sm:$0xff]  ;;  %v116_v44 = vld [vmem:[#allocation5 + $0x100] sm:$0xff] }
  0x66   :  { %1391 = vmatprep.subr.bf16.mxu0 %v1390_v26  ;;  %v1394_v39 = vpack.c.bf16 %v120_v36, %v115_v35  ;;  %v114_v41 = vld [vmem:[#allocation5 + $0xf0] sm:$0xff]  ;;  %v119_v42 = vld [vmem:[#allocation5 + $0x118] sm:$0xff]  ;;  %1519 = vmatprep.subr.bf16.mxu1 %v1518_v30  ;;  %v1522_v43 = vpack.c.bf16 %v122_v40, %v117_v37  ;;  %v121_v45 = vld [vmem:[#allocation5 + $0x128] sm:$0xff] }
  0x67   :  { %v125_v46 = vld [vmem:[#allocation5 + $0x148] sm:$0xff]  ;;  %v130_v47 = vld [vmem:[#allocation5 + $0x170] sm:$0xff]  ;;  %v127_v48 = vld [vmem:[#allocation5 + $0x158] sm:$0xff]  ;;  %v1396_v50 = vpack.c.bf16 %v119_v42, %v114_v41  ;;  %v1524_v51 = vpack.c.bf16 %v121_v45, %v116_v44 }
  0x68   :  { %v132_v49 = vld [vmem:[#allocation5 + $0x180] sm:$0xff]  ;;  %v1398_v52 = vpack.c.bf16 %v130_v47, %v125_v46  ;;  %v129_v54 = vld [vmem:[#allocation5 + $0x168] sm:$0xff]  ;;  %v126_v55 = vld [vmem:[#allocation5 + $0x150] sm:$0xff]  ;;  %v406_v46 = vlaneseq }
  0x69   :  { %1393 = vmatpush1.bf16.msra.mxu0 %v1392_v34  ;;  %1521 = vmatpush1.bf16.msra.mxu1 %v1520_v38  ;;  %v124_v53 = vld [vmem:[#allocation5 + $0x140] sm:$0xff]  ;;  %v1526_v56 = vpack.c.bf16 %v132_v49, %v127_v48  ;;  %v131_v57 = vld [vmem:[#allocation5 + $0x178] sm:$0xff]  ;;  %v137_v60 = vld [vmem:[#allocation5 + $0x1a8] sm:$0xff] }
  0x6a   :  { %1395 = vmatprep.subr.bf16.mxu0 %v1394_v39  ;;  %1523 = vmatprep.subr.bf16.mxu1 %v1522_v43  ;;  %v135_v58 = vld [vmem:[#allocation5 + $0x198] sm:$0xff]  ;;  %v140_v59 = vld [vmem:[#allocation5 + $0x1c0] sm:$0xff]  ;;  %v142_v61 = vld [vmem:[#allocation5 + $0x1d0] sm:$0xff]  ;;  %v1400_v62 = vpack.c.bf16 %v129_v54, %v124_v53  ;;  %v1528_v63 = vpack.c.bf16 %v131_v57, %v126_v55 }
  0x6b   :  { %v1402_v0 = vpack.c.bf16 %v140_v59, %v135_v58  ;;  %v134_v1 = vld [vmem:[#allocation5 + $0x190] sm:$0xff]  ;;  %v139_v2 = vld [vmem:[#allocation5 + $0x1b8] sm:$0xff]  ;;  %v136_v3 = vld [vmem:[#allocation5 + $0x1a0] sm:$0xff]  ;;  %v1530_v4 = vpack.c.bf16 %v142_v61, %v137_v60  ;;  %v2054_v59 = vshrl.u32 %v406_v46, 7 }
  0x6c   :  { %v141_v5 = vld [vmem:[#allocation5 + $0x1c8] sm:$0xff]  ;;  %v150_v7 = vld [vmem:[#allocation5 + $0x210] sm:$0xff]  ;;  %v147_v8 = vld [vmem:[#allocation5 + $0x1f8] sm:$0xff]  ;;  %v1404_v10 = vpack.c.bf16 %v139_v2, %v134_v1 }
  0x6d   :  { %1397 = vmatpush1.bf16.msra.mxu0 %v1396_v50  ;;  %1525 = vmatpush1.bf16.msra.mxu1 %v1524_v51  ;;  %v145_v6 = vld [vmem:[#allocation5 + $0x1e8] sm:$0xff]  ;;  %v152_v9 = vld [vmem:[#allocation5 + $0x220] sm:$0xff]  ;;  %v1532_v11 = vpack.c.bf16 %v141_v5, %v136_v3  ;;  %v146_v15 = vld [vmem:[#allocation5 + $0x1f0] sm:$0xff] }
  0x6e   :  { %1399 = vmatprep.subr.bf16.mxu0 %v1398_v52  ;;  %1527 = vmatprep.subr.bf16.mxu1 %v1526_v56  ;;  %v1406_v12 = vpack.c.bf16 %v150_v7, %v145_v6  ;;  %v144_v13 = vld [vmem:[#allocation5 + $0x1e0] sm:$0xff]  ;;  %v149_v14 = vld [vmem:[#allocation5 + $0x208] sm:$0xff]  ;;  %v1534_v16 = vpack.c.bf16 %v152_v9, %v147_v8  ;;  %v151_v17 = vld [vmem:[#allocation5 + $0x218] sm:$0xff]  ;;  %v412_v8 = vsub.s32 1, %v2054_v59 }
  0x6f   :  { %v155_v18 = vld [vmem:[#allocation5 + $0x238] sm:$0xff]  ;;  %v160_v19 = vld [vmem:[#allocation5 + $0x260] sm:$0xff]  ;;  %v157_v20 = vld [vmem:[#allocation5 + $0x248] sm:$0xff]  ;;  %v1408_v22 = vpack.c.bf16 %v149_v14, %v144_v13  ;;  %v1536_v23 = vpack.c.bf16 %v151_v17, %v146_v15 }
  0x70   :  { %v162_v21 = vld [vmem:[#allocation5 + $0x270] sm:$0xff]  ;;  %v1410_v24 = vpack.c.bf16 %v160_v19, %v155_v18  ;;  %v159_v26 = vld [vmem:[#allocation5 + $0x258] sm:$0xff]  ;;  %v156_v27 = vld [vmem:[#allocation5 + $0x240] sm:$0xff] }
  0x71   :  { %1401 = vmatpush1.bf16.msra.mxu0 %v1400_v62  ;;  %1529 = vmatpush1.bf16.msra.mxu1 %v1528_v63  ;;  %v154_v25 = vld [vmem:[#allocation5 + $0x230] sm:$0xff]  ;;  %v1538_v28 = vpack.c.bf16 %v162_v21, %v157_v20  ;;  %v161_v29 = vld [vmem:[#allocation5 + $0x268] sm:$0xff]  ;;  %v167_v32 = vld [vmem:[#allocation5 + $0x298] sm:$0xff] }
  0x72   :  { %1403 = vmatprep.subr.bf16.mxu0 %v1402_v0  ;;  %1531 = vmatprep.subr.bf16.mxu1 %v1530_v4  ;;  %v165_v30 = vld [vmem:[#allocation5 + $0x288] sm:$0xff]  ;;  %v170_v31 = vld [vmem:[#allocation5 + $0x2b0] sm:$0xff]  ;;  %v172_v33 = vld [vmem:[#allocation5 + $0x2c0] sm:$0xff]  ;;  %v1412_v34 = vpack.c.bf16 %v159_v26, %v154_v25  ;;  %v1540_v35 = vpack.c.bf16 %v161_v29, %v156_v27 }
  0x73   :  { %v1414_v36 = vpack.c.bf16 %v170_v31, %v165_v30  ;;  %v164_v37 = vld [vmem:[#allocation5 + $0x280] sm:$0xff]  ;;  %v169_v38 = vld [vmem:[#allocation5 + $0x2a8] sm:$0xff]  ;;  %v166_v39 = vld [vmem:[#allocation5 + $0x290] sm:$0xff]  ;;  %v1542_v40 = vpack.c.bf16 %v172_v33, %v167_v32 }
  0x74   :  { %v171_v41 = vld [vmem:[#allocation5 + $0x2b8] sm:$0xff]  ;;  %v180_v43 = vld [vmem:[#allocation5 + $0x300] sm:$0xff]  ;;  %v177_v44 = vld [vmem:[#allocation5 + $0x2e8] sm:$0xff]  ;;  %v1416_v47 = vpack.c.bf16 %v169_v38, %v164_v37 }
  0x75   :  { %1405 = vmatpush1.bf16.msra.mxu0 %v1404_v10  ;;  %1533 = vmatpush1.bf16.msra.mxu1 %v1532_v11  ;;  %v175_v42 = vld [vmem:[#allocation5 + $0x2d8] sm:$0xff]  ;;  %v182_v45 = vld [vmem:[#allocation5 + $0x310] sm:$0xff]  ;;  %v1544_v48 = vpack.c.bf16 %v171_v41, %v166_v39  ;;  %v176_v52 = vld [vmem:[#allocation5 + $0x2e0] sm:$0xff] }
  0x76   :  { %1407 = vmatprep.subr.bf16.mxu0 %v1406_v12  ;;  %1535 = vmatprep.subr.bf16.mxu1 %v1534_v16  ;;  %v1418_v49 = vpack.c.bf16 %v180_v43, %v175_v42  ;;  %v174_v50 = vld [vmem:[#allocation5 + $0x2d0] sm:$0xff]  ;;  %v179_v51 = vld [vmem:[#allocation5 + $0x2f8] sm:$0xff]  ;;  %v1546_v53 = vpack.c.bf16 %v182_v45, %v177_v44  ;;  %v181_v54 = vld [vmem:[#allocation5 + $0x308] sm:$0xff] }
  0x77   :  { %v185_v55 = vld [vmem:[#allocation5 + $0x328] sm:$0xff]  ;;  %v190_v56 = vld [vmem:[#allocation5 + $0x350] sm:$0xff]  ;;  %v187_v57 = vld [vmem:[#allocation5 + $0x338] sm:$0xff]  ;;  %v1420_v60 = vpack.c.bf16 %v179_v51, %v174_v50  ;;  %v1548_v61 = vpack.c.bf16 %v181_v54, %v176_v52 }
  0x78   :  { %v192_v58 = vld [vmem:[#allocation5 + $0x360] sm:$0xff]  ;;  %v1422_v62 = vpack.c.bf16 %v190_v56, %v185_v55  ;;  %v189_v0 = vld [vmem:[#allocation5 + $0x348] sm:$0xff]  ;;  %v186_v1 = vld [vmem:[#allocation5 + $0x330] sm:$0xff] }
  0x79   :  { %1409 = vmatpush1.bf16.msra.mxu0 %v1408_v22  ;;  %1537 = vmatpush1.bf16.msra.mxu1 %v1536_v23  ;;  %v184_v63 = vld [vmem:[#allocation5 + $0x320] sm:$0xff]  ;;  %v1550_v2 = vpack.c.bf16 %v192_v58, %v187_v57  ;;  %v191_v3 = vld [vmem:[#allocation5 + $0x358] sm:$0xff]  ;;  %v197_v6 = vld [vmem:[#allocation5 + $0x388] sm:$0xff] }
  0x7a   :  { %1411 = vmatprep.subr.bf16.mxu0 %v1410_v24  ;;  %1539 = vmatprep.subr.bf16.mxu1 %v1538_v28  ;;  %v195_v4 = vld [vmem:[#allocation5 + $0x378] sm:$0xff]  ;;  %v200_v5 = vld [vmem:[#allocation5 + $0x3a0] sm:$0xff]  ;;  %v202_v7 = vld [vmem:[#allocation5 + $0x3b0] sm:$0xff]  ;;  %v1424_v9 = vpack.c.bf16 %v189_v0, %v184_v63  ;;  %v1552_v11 = vpack.c.bf16 %v191_v3, %v186_v1 }
  0x7b   :  { %v194_v10 = vld [vmem:[#allocation5 + $0x370] sm:$0xff]  ;;  %v1426_v12 = vpack.c.bf16 %v200_v5, %v195_v4  ;;  %v199_v13 = vld [vmem:[#allocation5 + $0x398] sm:$0xff]  ;;  %v196_v14 = vld [vmem:[#allocation5 + $0x380] sm:$0xff]  ;;  %v1554_v16 = vpack.c.bf16 %v202_v7, %v197_v6 }
  0x7c   :  { %v201_v15 = vld [vmem:[#allocation5 + $0x3a8] sm:$0xff]  ;;  %v210_v18 = vld [vmem:[#allocation5 + $0x3f0] sm:$0xff]  ;;  %v2057_v19 = vld [vmem:[#allocation2] sm:$0xf]  ;;  %v1428_v23 = vpack.c.bf16 %v199_v13, %v194_v10 }
  0x7d   :  { %1413 = vmatpush1.bf16.msra.mxu0 %v1412_v34  ;;  %1541 = vmatpush1.bf16.msra.mxu1 %v1540_v35  ;;  %v205_v17 = vld [vmem:[#allocation5 + $0x3c8] sm:$0xff]  ;;  %v207_v20 = vld [vmem:[#allocation5 + $0x3d8] sm:$0xff]  ;;  %v212_v21 = vld [vmem:[#allocation5 + $0x400] sm:$0xff]  ;;  %v2062_v22 = vrot.slane %v2057_v19, %v412_v8  ;;  %v1556_v24 = vpack.c.bf16 %v201_v15, %v196_v14 }
  0x7e   :  { %1415 = vmatprep.subr.bf16.mxu0 %v1414_v36  ;;  %1543 = vmatprep.subr.bf16.mxu1 %v1542_v40  ;;  %v1430_v25 = vpack.c.bf16 %v210_v18, %v205_v17  ;;  %v204_v26 = vld [vmem:[#allocation5 + $0x3c0] sm:$0xff]  ;;  %v209_v27 = vld [vmem:[#allocation5 + $0x3e8] sm:$0xff]  ;;  %v206_v28 = vld [vmem:[#allocation5 + $0x3d0] sm:$0xff]  ;;  %v1558_v29 = vpack.c.bf16 %v212_v21, %v207_v20  ;;  %v420_v21 = vsub.s32 3, %v2054_v59 }
  0x7f   :  { %v211_v30 = vld [vmem:[#allocation5 + $0x3f8] sm:$0xff]  ;;  %v220_v32 = vld [vmem:[#allocation5 + $0x440] sm:$0xff]  ;;  %516 = vmatprep.mubr.f32.mxu0 %v2062_v22  ;;  %v217_v33 = vld [vmem:[#allocation5 + $0x428] sm:$0xff]  ;;  %658 = vmatprep.mubr.f32.mxu1 %v2062_v22  ;;  %v1432_v35 = vpack.c.bf16 %v209_v27, %v204_v26 }
  0x80   :  { %v215_v31 = vld [vmem:[#allocation5 + $0x418] sm:$0xff]  ;;  %v222_v34 = vld [vmem:[#allocation5 + $0x450] sm:$0xff]  ;;  %v1560_v36 = vpack.c.bf16 %v211_v30, %v206_v28  ;;  %v216_v40 = vld [vmem:[#allocation5 + $0x420] sm:$0xff] }
  0x81   :  { %1417 = vmatpush1.bf16.msra.mxu0 %v1416_v47  ;;  %1545 = vmatpush1.bf16.msra.mxu1 %v1544_v48  ;;  %v1434_v37 = vpack.c.bf16 %v220_v32, %v215_v31  ;;  %v214_v38 = vld [vmem:[#allocation5 + $0x410] sm:$0xff]  ;;  %v219_v39 = vld [vmem:[#allocation5 + $0x438] sm:$0xff]  ;;  %v1562_v41 = vpack.c.bf16 %v222_v34, %v217_v33  ;;  %v221_v42 = vld [vmem:[#allocation5 + $0x448] sm:$0xff] }
  0x82   :  { %1419 = vmatprep.subr.bf16.mxu0 %v1418_v49  ;;  %1547 = vmatprep.subr.bf16.mxu1 %v1546_v53  ;;  %v225_v43 = vld [vmem:[#allocation5 + $0x468] sm:$0xff]  ;;  %v230_v44 = vld [vmem:[#allocation5 + $0x490] sm:$0xff]  ;;  %v227_v45 = vld [vmem:[#allocation5 + $0x478] sm:$0xff]  ;;  %v1436_v47 = vpack.c.bf16 %v219_v39, %v214_v38  ;;  %v1564_v48 = vpack.c.bf16 %v221_v42, %v216_v40 }
  0x83   :  { %v232_v46 = vld [vmem:[#allocation5 + $0x4a0] sm:$0xff]  ;;  %v1438_v49 = vpack.c.bf16 %v230_v44, %v225_v43  ;;  %v229_v51 = vld [vmem:[#allocation5 + $0x488] sm:$0xff]  ;;  %v226_v52 = vld [vmem:[#allocation5 + $0x470] sm:$0xff] }
  0x84   :  { %v224_v50 = vld [vmem:[#allocation5 + $0x460] sm:$0xff]  ;;  %v1566_v53 = vpack.c.bf16 %v232_v46, %v227_v45  ;;  %v231_v54 = vld [vmem:[#allocation5 + $0x498] sm:$0xff]  ;;  %v237_v57 = vld [vmem:[#allocation5 + $0x4c8] sm:$0xff] }
  0x85   :  { %1421 = vmatpush1.bf16.msra.mxu0 %v1420_v60  ;;  %1549 = vmatpush1.bf16.msra.mxu1 %v1548_v61  ;;  %v235_v55 = vld [vmem:[#allocation5 + $0x4b8] sm:$0xff]  ;;  %v240_v56 = vld [vmem:[#allocation5 + $0x4e0] sm:$0xff]  ;;  %v242_v58 = vld [vmem:[#allocation5 + $0x4f0] sm:$0xff]  ;;  %v1440_v60 = vpack.c.bf16 %v229_v51, %v224_v50  ;;  %v1568_v61 = vpack.c.bf16 %v231_v54, %v226_v52 }
  0x86   :  { %1423 = vmatprep.subr.bf16.mxu0 %v1422_v62  ;;  %1551 = vmatprep.subr.bf16.mxu1 %v1550_v2  ;;  %v1442_v62 = vpack.c.bf16 %v240_v56, %v235_v55  ;;  %v234_v63 = vld [vmem:[#allocation5 + $0x4b0] sm:$0xff]  ;;  %v239_v0 = vld [vmem:[#allocation5 + $0x4d8] sm:$0xff]  ;;  %v236_v1 = vld [vmem:[#allocation5 + $0x4c0] sm:$0xff]  ;;  %v1570_v2 = vpack.c.bf16 %v242_v58, %v237_v57 }
  0x87   :  { %v241_v3 = vld [vmem:[#allocation5 + $0x4e8] sm:$0xff]  ;;  %v250_v5 = vld [vmem:[#allocation5 + $0x530] sm:$0xff]  ;;  %v247_v6 = vld [vmem:[#allocation5 + $0x518] sm:$0xff]  ;;  %v1444_v10 = vpack.c.bf16 %v239_v0, %v234_v63 }
  0x88   :  { %v245_v4 = vld [vmem:[#allocation5 + $0x508] sm:$0xff]  ;;  %v252_v7 = vld [vmem:[#allocation5 + $0x540] sm:$0xff]  ;;  %v246_v15 = vld [vmem:[#allocation5 + $0x510] sm:$0xff] }
  0x89   :  { %1425 = vmatpush1.bf16.msra.mxu0 %v1424_v9  ;;  %1553 = vmatpush1.bf16.msra.mxu1 %v1552_v11  ;;  %v408_v9 = vsub.s32 0, %v2054_v59  ;;  %v1572_v11 = vpack.c.bf16 %v241_v3, %v236_v1  ;;  %v244_v13 = vld [vmem:[#allocation5 + $0x500] sm:$0xff]  ;;  %v249_v14 = vld [vmem:[#allocation5 + $0x528] sm:$0xff]  ;;  %v251_v17 = vld [vmem:[#allocation5 + $0x538] sm:$0xff] }
  0x8a   :  { %1427 = vmatprep.subr.bf16.mxu0 %v1426_v12  ;;  %1555 = vmatprep.subr.bf16.mxu1 %v1554_v16  ;;  %v1446_v12 = vpack.c.bf16 %v250_v5, %v245_v4  ;;  %v1574_v16 = vpack.c.bf16 %v252_v7, %v247_v6  ;;  %v255_v18 = vld [vmem:[#allocation5 + $0x558] sm:$0xff]  ;;  %v260_v20 = vld [vmem:[#allocation5 + $0x580] sm:$0xff]  ;;  %v1448_v26 = vpack.c.bf16 %v249_v14, %v244_v13  ;;  %v261_v33 = vld [vmem:[#allocation5 + $0x588] sm:$0xff] }
  0x8b   :  { %v1576_v27 = vpack.c.bf16 %v251_v17, %v246_v15  ;;  %v1450_v28 = vpack.c.bf16 %v260_v20, %v255_v18  ;;  %v259_v30 = vld [vmem:[#allocation5 + $0x578] sm:$0xff]  ;;  %v256_v31 = vld [vmem:[#allocation5 + $0x560] sm:$0xff]  ;;  %v265_v34 = vld [vmem:[#allocation5 + $0x5a8] sm:$0xff] }
  0x8c   :  { %v272_v38 = vld [vmem:[#allocation5 + $0x5e0] sm:$0xff]  ;;  %v1580_v40 = vpack.c.bf16 %v261_v33, %v256_v31  ;;  %v269_v43 = vld [vmem:[#allocation5 + $0x5c8] sm:$0xff]  ;;  %v266_v44 = vld [vmem:[#allocation5 + $0x5b0] sm:$0xff] }
  0x8d   :  { %1429 = vmatpush1.bf16.msra.mxu0 %v1428_v23  ;;  %1557 = vmatpush1.bf16.msra.mxu1 %v1556_v24  ;;  %v2071_v23 = vrot.slane %v2057_v19, %v408_v9  ;;  %v257_v24 = vld [vmem:[#allocation5 + $0x568] sm:$0xff]  ;;  %v264_v42 = vld [vmem:[#allocation5 + $0x5a0] sm:$0xff]  ;;  %v271_v46 = vld [vmem:[#allocation5 + $0x5d8] sm:$0xff] }
  0x8e   :  { %1431 = vmatprep.subr.bf16.mxu0 %v1430_v25  ;;  %1559 = vmatprep.subr.bf16.mxu1 %v1558_v29  ;;  %v262_v25 = vld [vmem:[#allocation5 + $0x590] sm:$0xff]  ;;  %v1456_v51 = vpack.c.bf16 %v269_v43, %v264_v42  ;;  %v1584_v52 = vpack.c.bf16 %v271_v46, %v266_v44  ;;  %v279_v55 = vld [vmem:[#allocation5 + $0x618] sm:$0xff]  ;;  %v276_v56 = vld [vmem:[#allocation5 + $0x600] sm:$0xff] }
  0x8f   :  { %v254_v29 = vld [vmem:[#allocation5 + $0x550] sm:$0xff]  ;;  %v1578_v32 = vpack.c.bf16 %v262_v25, %v257_v24  ;;  %v281_v58 = vld [vmem:[#allocation5 + $0x628] sm:$0xff]  ;;  %v292_v63 = vld [vmem:[#allocation5 + $0x680] sm:$0xff] }
  0x90   :  { %v1452_v39 = vpack.c.bf16 %v259_v30, %v254_v29  ;;  %v282_v50 = vld [vmem:[#allocation5 + $0x630] sm:$0xff]  ;;  %v1588_v1 = vpack.c.bf16 %v281_v58, %v276_v56  ;;  %v284_v3 = vld [vmem:[#allocation5 + $0x640] sm:$0xff]  ;;  %v289_v4 = vld [vmem:[#allocation5 + $0x668] sm:$0xff] }
  0x91   :  { %1433 = vmatpush1.bf16.msra.mxu0 %v1432_v35  ;;  %1561 = vmatpush1.bf16.msra.mxu1 %v1560_v36  ;;  %v270_v35 = vld [vmem:[#allocation5 + $0x5d0] sm:$0xff]  ;;  %v2076_v36 = vrot.slane %v2057_v19, %v420_v21  ;;  %v291_v7 = vld [vmem:[#allocation5 + $0x678] sm:$0xff]  ;;  %v1464_v14 = vpack.c.bf16 %v289_v4, %v284_v3  ;;  %v296_v20 = vld [vmem:[#allocation5 + $0x6a0] sm:$0xff] }
  0x92   :  { %1435 = vmatprep.subr.bf16.mxu0 %v1434_v37  ;;  %1563 = vmatprep.subr.bf16.mxu1 %v1562_v41  ;;  %v267_v37 = vld [vmem:[#allocation5 + $0x5b8] sm:$0xff]  ;;  %v1454_v41 = vpack.c.bf16 %v270_v35, %v265_v34  ;;  %v274_v54 = vld [vmem:[#allocation5 + $0x5f0] sm:$0xff]  ;;  %v301_v25 = vld [vmem:[#allocation5 + $0x6c8] sm:$0xff] }
  0x93   :  { %v1582_v45 = vpack.c.bf16 %v272_v38, %v267_v37  ;;  %v1460_v0 = vpack.c.bf16 %v279_v55, %v274_v54  ;;  %v286_v5 = vld [vmem:[#allocation5 + $0x650] sm:$0xff]  ;;  %v299_v18 = vld [vmem:[#allocation5 + $0x6b8] sm:$0xff]  ;;  %v312_v29 = vld [vmem:[#allocation5 + $0x720] sm:$0xff]  ;;  %v1596_v31 = vpack.c.bf16 %v301_v25, %v296_v20 }
  0x94   :  { %v302_v13 = vld [vmem:[#allocation5 + $0x6d0] sm:$0xff]  ;;  %v1592_v15 = vpack.c.bf16 %v291_v7, %v286_v5  ;;  %v304_v33 = vld [vmem:[#allocation5 + $0x6e0] sm:$0xff]  ;;  %v309_v34 = vld [vmem:[#allocation5 + $0x708] sm:$0xff] }
  0x95   :  { %1437 = vmatpush1.bf16.msra.mxu0 %v1436_v47  ;;  %1565 = vmatpush1.bf16.msra.mxu1 %v1564_v48  ;;  %v275_v47 = vld [vmem:[#allocation5 + $0x5f8] sm:$0xff]  ;;  %v280_v48 = vld [vmem:[#allocation5 + $0x620] sm:$0xff]  ;;  %v294_v17 = vld [vmem:[#allocation5 + $0x690] sm:$0xff]  ;;  %v1472_v43 = vpack.c.bf16 %v309_v34, %v304_v33 }
  0x96   :  { %1439 = vmatprep.subr.bf16.mxu0 %v1438_v49  ;;  %1567 = vmatprep.subr.bf16.mxu1 %v1566_v53  ;;  %v277_v49 = vld [vmem:[#allocation5 + $0x608] sm:$0xff]  ;;  %v1458_v53 = vpack.c.bf16 %v280_v48, %v275_v47  ;;  %v1468_v30 = vpack.c.bf16 %v299_v18, %v294_v17  ;;  %v306_v35 = vld [vmem:[#allocation5 + $0x6f0] sm:$0xff]  ;;  %v311_v38 = vld [vmem:[#allocation5 + $0x718] sm:$0xff] }
  0x97   :  { %v1586_v57 = vpack.c.bf16 %v282_v50, %v277_v49  ;;  %v322_v42 = vld [vmem:[#allocation5 + $0x770] sm:$0xff]  ;;  %v1600_v44 = vpack.c.bf16 %v311_v38, %v306_v35  ;;  %v319_v47 = vld [vmem:[#allocation5 + $0x758] sm:$0xff]  ;;  %v316_v48 = vld [vmem:[#allocation5 + $0x740] sm:$0xff] }
  0x98   :  { %v314_v46 = vld [vmem:[#allocation5 + $0x730] sm:$0xff]  ;;  %v321_v50 = vld [vmem:[#allocation5 + $0x768] sm:$0xff]  ;;  %v332_v54 = vld [vmem:[#allocation5 + $0x7c0] sm:$0xff] }
  0x99   :  { %1441 = vmatpush1.bf16.msra.mxu0 %v1440_v60  ;;  %1569 = vmatpush1.bf16.msra.mxu1 %v1568_v61  ;;  %v285_v60 = vld [vmem:[#allocation5 + $0x648] sm:$0xff]  ;;  %v290_v61 = vld [vmem:[#allocation5 + $0x670] sm:$0xff]  ;;  %v1476_v55 = vpack.c.bf16 %v319_v47, %v314_v46  ;;  %v1604_v56 = vpack.c.bf16 %v321_v50, %v316_v48  ;;  %v324_v58 = vld [vmem:[#allocation5 + $0x780] sm:$0xff] }
  0x9a   :  { %1443 = vmatprep.subr.bf16.mxu0 %v1442_v62  ;;  %1571 = vmatprep.subr.bf16.mxu1 %v1570_v2  ;;  %v287_v62 = vld [vmem:[#allocation5 + $0x658] sm:$0xff]  ;;  %v1462_v2 = vpack.c.bf16 %v290_v61, %v285_v60  ;;  %v329_v60 = vld [vmem:[#allocation5 + $0x7a8] sm:$0xff]  ;;  %v326_v61 = vld [vmem:[#allocation5 + $0x790] sm:$0xff] }
  0x9b   :  { %v1590_v6 = vpack.c.bf16 %v292_v63, %v287_v62  ;;  %v331_v63 = vld [vmem:[#allocation5 + $0x7b8] sm:$0xff]  ;;  %v342_v3 = vld [vmem:[#allocation5 + $0x810] sm:$0xff]  ;;  %v1480_v4 = vpack.c.bf16 %v329_v60, %v324_v58  ;;  %v352_v17 = vld [vmem:[#allocation5 + $0x860] sm:$0xff] }
  0x9c   :  { %v1608_v5 = vpack.c.bf16 %v331_v63, %v326_v61  ;;  %v334_v7 = vld [vmem:[#allocation5 + $0x7d0] sm:$0xff]  ;;  %v344_v25 = vld [vmem:[#allocation5 + $0x820] sm:$0xff] }
  0x9d   :  { %1445 = vmatpush1.bf16.msra.mxu0 %v1444_v10  ;;  %1573 = vmatpush1.bf16.msra.mxu1 %v1572_v11  ;;  %v295_v10 = vld [vmem:[#allocation5 + $0x698] sm:$0xff]  ;;  %v300_v11 = vld [vmem:[#allocation5 + $0x6c0] sm:$0xff]  ;;  %v362_v33 = vld [vmem:[#allocation5 + $0x8b0] sm:$0xff] }
  0x9e   :  { %1447 = vmatprep.subr.bf16.mxu0 %v1446_v12  ;;  %1575 = vmatprep.subr.bf16.mxu1 %v1574_v16  ;;  %v297_v12 = vld [vmem:[#allocation5 + $0x6a8] sm:$0xff]  ;;  %v1466_v16 = vpack.c.bf16 %v300_v11, %v295_v10  ;;  %v339_v10 = vld [vmem:[#allocation5 + $0x7f8] sm:$0xff]  ;;  %v336_v11 = vld [vmem:[#allocation5 + $0x7e0] sm:$0xff] }
  0x9f   :  { %v1594_v24 = vpack.c.bf16 %v302_v13, %v297_v12  ;;  %v341_v13 = vld [vmem:[#allocation5 + $0x808] sm:$0xff]  ;;  %v1484_v18 = vpack.c.bf16 %v339_v10, %v334_v7  ;;  %v354_v38 = vld [vmem:[#allocation5 + $0x870] sm:$0xff]  ;;  %v372_v46 = vld [vmem:[#allocation5 + $0x900] sm:$0xff] }
  0xa0   :  { %517 = vmatmul.mubr.f32.vlgmr.msra.gmra.mrb[0].mxu0 %v2071_v23  ;;  %659 = vmatmul.mubr.f32.vlgmr.msra.gmra.mrb[0].mxu1 %v2071_v23  ;;  %v1612_v20 = vpack.c.bf16 %v341_v13, %v336_v11  ;;  %v364_v50 = vld [vmem:[#allocation5 + $0x8c0] sm:$0xff]  ;;  %v382_v58 = vld [vmem:[#allocation5 + $0x950] sm:$0xff] }
  0xa1   :  { %1449 = vmatpush1.bf16.msra.mxu0 %v1448_v26  ;;  %1577 = vmatpush1.bf16.msra.mxu1 %v1576_v27  ;;  %v305_v26 = vld [vmem:[#allocation5 + $0x6e8] sm:$0xff]  ;;  %v310_v27 = vld [vmem:[#allocation5 + $0x710] sm:$0xff]  ;;  %v392_v7 = vld [vmem:[#allocation5 + $0x9a0] sm:$0xff] }
  0xa2   :  { %1451 = vmatprep.subr.bf16.mxu0 %v1450_v28  ;;  %1579 = vmatprep.subr.bf16.mxu1 %v1578_v32  ;;  %v307_v28 = vld [vmem:[#allocation5 + $0x6f8] sm:$0xff]  ;;  %v1470_v32 = vpack.c.bf16 %v310_v27, %v305_v26  ;;  %v349_v26 = vld [vmem:[#allocation5 + $0x848] sm:$0xff]  ;;  %v346_v27 = vld [vmem:[#allocation5 + $0x830] sm:$0xff] }
  0xa3   :  { %587 = vmatprep.mubr.f32.mxu0 %v2076_v36  ;;  %729 = vmatprep.mubr.f32.mxu1 %v2076_v36  ;;  %v1598_v37 = vpack.c.bf16 %v312_v29, %v307_v28  ;;  %v351_v29 = vld [vmem:[#allocation5 + $0x858] sm:$0xff]  ;;  %v1488_v34 = vpack.c.bf16 %v349_v26, %v344_v25  ;;  %v374_v63 = vld [vmem:[#allocation5 + $0x910] sm:$0xff]  ;;  %v384_v13 = vld [vmem:[#allocation5 + $0x960] sm:$0xff] }
  0xa4   :  { %v1616_v35 = vpack.c.bf16 %v351_v29, %v346_v27  ;;  %v402_v25 = vld [vmem:[#allocation5 + $0x9f0] sm:$0xff] }
  0xa5   :  { %1453 = vmatpush1.bf16.msra.mxu0 %v1452_v39  ;;  %1581 = vmatpush1.bf16.msra.mxu1 %v1580_v40  ;;  %v315_v39 = vld [vmem:[#allocation5 + $0x738] sm:$0xff]  ;;  %v320_v40 = vld [vmem:[#allocation5 + $0x760] sm:$0xff]  ;;  %v394_v29 = vld [vmem:[#allocation5 + $0x9b0] sm:$0xff] }
  0xa6   :  { %1455 = vmatprep.subr.bf16.mxu0 %v1454_v41  ;;  %1583 = vmatprep.subr.bf16.mxu1 %v1582_v45  ;;  %v317_v41 = vld [vmem:[#allocation5 + $0x748] sm:$0xff]  ;;  %v1474_v45 = vpack.c.bf16 %v320_v40, %v315_v39  ;;  %v359_v39 = vld [vmem:[#allocation5 + $0x898] sm:$0xff]  ;;  %v356_v40 = vld [vmem:[#allocation5 + $0x880] sm:$0xff] }
  0xa7   :  { %v1602_v49 = vpack.c.bf16 %v322_v42, %v317_v41  ;;  %v361_v42 = vld [vmem:[#allocation5 + $0x8a8] sm:$0xff]  ;;  %v1492_v47 = vpack.c.bf16 %v359_v39, %v354_v38  ;;  %v328_v38 = vld [vmem:[#allocation5 + $0x7a0] sm:$0xff] }
  0xa8   :  { %v1620_v48 = vpack.c.bf16 %v361_v42, %v356_v40  ;;  %v333_v39 = vld [vmem:[#allocation5 + $0x7c8] sm:$0xff] }
  0xa9   :  { %1457 = vmatpush1.bf16.msra.mxu0 %v1456_v51  ;;  %1585 = vmatpush1.bf16.msra.mxu1 %v1584_v52  ;;  %v325_v51 = vld [vmem:[#allocation5 + $0x788] sm:$0xff]  ;;  %v330_v52 = vld [vmem:[#allocation5 + $0x7b0] sm:$0xff] }
  0xaa   :  { %1459 = vmatprep.subr.bf16.mxu0 %v1458_v53  ;;  %1587 = vmatprep.subr.bf16.mxu1 %v1586_v57  ;;  %v327_v53 = vld [vmem:[#allocation5 + $0x798] sm:$0xff]  ;;  %v1478_v57 = vpack.c.bf16 %v330_v52, %v325_v51  ;;  %v369_v51 = vld [vmem:[#allocation5 + $0x8e8] sm:$0xff]  ;;  %v366_v52 = vld [vmem:[#allocation5 + $0x8d0] sm:$0xff] }
  0xab   :  { %v1606_v62 = vpack.c.bf16 %v332_v54, %v327_v53  ;;  %v371_v54 = vld [vmem:[#allocation5 + $0x8f8] sm:$0xff]  ;;  %v1496_v60 = vpack.c.bf16 %v369_v51, %v364_v50  ;;  %v338_v51 = vld [vmem:[#allocation5 + $0x7f0] sm:$0xff] }
  0xac   :  { %v1624_v61 = vpack.c.bf16 %v371_v54, %v366_v52  ;;  %v343_v52 = vld [vmem:[#allocation5 + $0x818] sm:$0xff] }
  0xad   :  { %1461 = vmatpush1.bf16.msra.mxu0 %v1460_v0  ;;  %1589 = vmatpush1.bf16.msra.mxu1 %v1588_v1  ;;  %v335_v0 = vld [vmem:[#allocation5 + $0x7d8] sm:$0xff]  ;;  %v340_v1 = vld [vmem:[#allocation5 + $0x800] sm:$0xff] }
  0xae   :  { %1463 = vmatprep.subr.bf16.mxu0 %v1462_v2  ;;  %1591 = vmatprep.subr.bf16.mxu1 %v1590_v6  ;;  %v337_v2 = vld [vmem:[#allocation5 + $0x7e8] sm:$0xff]  ;;  %v1482_v6 = vpack.c.bf16 %v340_v1, %v335_v0  ;;  %v379_v0 = vld [vmem:[#allocation5 + $0x938] sm:$0xff]  ;;  %v376_v1 = vld [vmem:[#allocation5 + $0x920] sm:$0xff] }
  0xaf   :  { %v1610_v12 = vpack.c.bf16 %v342_v3, %v337_v2  ;;  %v381_v3 = vld [vmem:[#allocation5 + $0x948] sm:$0xff]  ;;  %v1500_v10 = vpack.c.bf16 %v379_v0, %v374_v63 }
  0xb0   :  { %v1628_v11 = vpack.c.bf16 %v381_v3, %v376_v1  ;;  %v193_v63 = vld [vmem:[#allocation5 + $0x368] sm:$0xff] }
  0xb1   :  { %1465 = vmatpush1.bf16.msra.mxu0 %v1464_v14  ;;  %1593 = vmatpush1.bf16.msra.mxu1 %v1592_v15  ;;  %v345_v14 = vld [vmem:[#allocation5 + $0x828] sm:$0xff]  ;;  %v350_v15 = vld [vmem:[#allocation5 + $0x850] sm:$0xff] }
  0xb2   :  { %1467 = vmatprep.subr.bf16.mxu0 %v1466_v16  ;;  %1595 = vmatprep.subr.bf16.mxu1 %v1594_v24  ;;  %v347_v16 = vld [vmem:[#allocation5 + $0x838] sm:$0xff]  ;;  %v1486_v24 = vpack.c.bf16 %v350_v15, %v345_v14  ;;  %v389_v14 = vld [vmem:[#allocation5 + $0x988] sm:$0xff]  ;;  %v386_v15 = vld [vmem:[#allocation5 + $0x970] sm:$0xff] }
  0xb3   :  { %v1614_v28 = vpack.c.bf16 %v352_v17, %v347_v16  ;;  %v391_v17 = vld [vmem:[#allocation5 + $0x998] sm:$0xff]  ;;  %v1504_v26 = vpack.c.bf16 %v389_v14, %v384_v13  ;;  %v353_v0 = vld [vmem:[#allocation5 + $0x868] sm:$0xff]  ;;  %v358_v13 = vld [vmem:[#allocation5 + $0x890] sm:$0xff] }
  0xb4   :  { %v1632_v27 = vpack.c.bf16 %v391_v17, %v386_v15  ;;  %v363_v14 = vld [vmem:[#allocation5 + $0x8b8] sm:$0xff] }
  0xb5   :  { %1469 = vmatpush1.bf16.msra.mxu0 %v1468_v30  ;;  %1597 = vmatpush1.bf16.msra.mxu1 %v1596_v31  ;;  %v355_v30 = vld [vmem:[#allocation5 + $0x878] sm:$0xff]  ;;  %v360_v31 = vld [vmem:[#allocation5 + $0x8a0] sm:$0xff] }
  0xb6   :  { %1471 = vmatprep.subr.bf16.mxu0 %v1470_v32  ;;  %1599 = vmatprep.subr.bf16.mxu1 %v1598_v37  ;;  %v357_v32 = vld [vmem:[#allocation5 + $0x888] sm:$0xff]  ;;  %v1490_v37 = vpack.c.bf16 %v360_v31, %v355_v30  ;;  %v399_v30 = vld [vmem:[#allocation5 + $0x9d8] sm:$0xff]  ;;  %v396_v31 = vld [vmem:[#allocation5 + $0x9c0] sm:$0xff] }
  0xb7   :  { %v1618_v41 = vpack.c.bf16 %v362_v33, %v357_v32  ;;  %v401_v33 = vld [vmem:[#allocation5 + $0x9e8] sm:$0xff]  ;;  %v1508_v40 = vpack.c.bf16 %v399_v30, %v394_v29  ;;  %v368_v29 = vld [vmem:[#allocation5 + $0x8e0] sm:$0xff] }
  0xb9   :  { %1473 = vmatpush1.bf16.msra.mxu0 %v1472_v43  ;;  %1601 = vmatpush1.bf16.msra.mxu1 %v1600_v44  ;;  %v365_v43 = vld [vmem:[#allocation5 + $0x8c8] sm:$0xff]  ;;  %v370_v44 = vld [vmem:[#allocation5 + $0x8f0] sm:$0xff] }
  0xba   :  { %1475 = vmatprep.subr.bf16.mxu0 %v1474_v45  ;;  %1603 = vmatprep.subr.bf16.mxu1 %v1602_v49  ;;  %v367_v45 = vld [vmem:[#allocation5 + $0x8d8] sm:$0xff]  ;;  %v1494_v49 = vpack.c.bf16 %v370_v44, %v365_v43  ;;  %v88_v43 = vld [vmem:[#allocation5 + $0x20] sm:$0xff]  ;;  %v93_v44 = vld [vmem:[#allocation5 + $0x48] sm:$0xff] }
  0xbb   :  { %v1622_v53 = vpack.c.bf16 %v372_v46, %v367_v45  ;;  %v248_v45 = vld [vmem:[#allocation5 + $0x520] sm:$0xff]  ;;  %v1670_v46 = vpack.c.bf16 %v333_v39, %v328_v38  ;;  %v293_v38 = vld [vmem:[#allocation5 + $0x688] sm:$0xff]  ;;  %v218_v39 = vld [vmem:[#allocation5 + $0x430] sm:$0xff] }
  0xbd   :  { %1477 = vmatpush1.bf16.msra.mxu0 %v1476_v55  ;;  %1605 = vmatpush1.bf16.msra.mxu1 %v1604_v56  ;;  %v375_v55 = vld [vmem:[#allocation5 + $0x918] sm:$0xff]  ;;  %v380_v56 = vld [vmem:[#allocation5 + $0x940] sm:$0xff] }
  0xbe   :  { %1479 = vmatprep.subr.bf16.mxu0 %v1478_v57  ;;  %1607 = vmatprep.subr.bf16.mxu1 %v1606_v62  ;;  %v377_v57 = vld [vmem:[#allocation5 + $0x928] sm:$0xff]  ;;  %v1498_v62 = vpack.c.bf16 %v380_v56, %v375_v55  ;;  %v98_v56 = vld [vmem:[#allocation5 + $0x70] sm:$0xff] }
  0xbf   :  { %v1626_v2 = vpack.c.bf16 %v382_v58, %v377_v57  ;;  %v103_v57 = vld [vmem:[#allocation5 + $0x98] sm:$0xff]  ;;  %v258_v58 = vld [vmem:[#allocation5 + $0x570] sm:$0xff] }
  0xc0   :  { %v1644_v1 = vpack.c.bf16 %v103_v57, %v98_v56 }
  0xc1   :  { %1481 = vmatpush1.bf16.msra.mxu0 %v1480_v4  ;;  %1609 = vmatpush1.bf16.msra.mxu1 %v1608_v5  ;;  %v385_v4 = vld [vmem:[#allocation5 + $0x968] sm:$0xff]  ;;  %v390_v5 = vld [vmem:[#allocation5 + $0x990] sm:$0xff] }
  0xc2   :  { %1483 = vmatprep.subr.bf16.mxu0 %v1482_v6  ;;  %1611 = vmatprep.subr.bf16.mxu1 %v1610_v12  ;;  %v387_v6 = vld [vmem:[#allocation5 + $0x978] sm:$0xff]  ;;  %v1502_v12 = vpack.c.bf16 %v390_v5, %v385_v4  ;;  %v108_v4 = vld [vmem:[#allocation5 + $0xc0] sm:$0xff]  ;;  %v113_v5 = vld [vmem:[#allocation5 + $0xe8] sm:$0xff] }
  0xc3   :  { %v1630_v16 = vpack.c.bf16 %v392_v7, %v387_v6  ;;  %v268_v6 = vld [vmem:[#allocation5 + $0x5c0] sm:$0xff]  ;;  %v1648_v15 = vpack.c.bf16 %v113_v5, %v108_v4 }
  0xc5   :  { %1485 = vmatpush1.bf16.msra.mxu0 %v1484_v18  ;;  %1613 = vmatpush1.bf16.msra.mxu1 %v1612_v20  ;;  %v395_v18 = vld [vmem:[#allocation5 + $0x9b8] sm:$0xff]  ;;  %v400_v20 = vld [vmem:[#allocation5 + $0x9e0] sm:$0xff] }
  0xc6   :  { %1487 = vmatprep.subr.bf16.mxu0 %v1486_v24  ;;  %1615 = vmatprep.subr.bf16.mxu1 %v1614_v28  ;;  %v397_v24 = vld [vmem:[#allocation5 + $0x9c8] sm:$0xff]  ;;  %v1506_v28 = vpack.c.bf16 %v400_v20, %v395_v18  ;;  %v118_v18 = vld [vmem:[#allocation5 + $0x110] sm:$0xff]  ;;  %v123_v20 = vld [vmem:[#allocation5 + $0x138] sm:$0xff] }
  0xc7   :  { %v1634_v32 = vpack.c.bf16 %v402_v25, %v397_v24  ;;  %v278_v24 = vld [vmem:[#allocation5 + $0x610] sm:$0xff]  ;;  %v1682_v25 = vpack.c.bf16 %v363_v14, %v358_v13  ;;  %v1652_v30 = vpack.c.bf16 %v123_v20, %v118_v18  ;;  %v323_v13 = vld [vmem:[#allocation5 + $0x778] sm:$0xff]  ;;  %v897_v14 = vld [vmem:[#allocation8 + $0x80] sm:$0xff] }
  0xc9   :  { %1489 = vmatpush1.bf16.msra.mxu0 %v1488_v34  ;;  %1617 = vmatpush1.bf16.msra.mxu1 %v1616_v35  ;;  %v168_v34 = vld [vmem:[#allocation5 + $0x2a0] sm:$0xff]  ;;  %v173_v35 = vld [vmem:[#allocation5 + $0x2c8] sm:$0xff] }
  0xca   :  { %1491 = vmatprep.subr.bf16.mxu0 %v1490_v37  ;;  %1619 = vmatprep.subr.bf16.mxu1 %v1618_v41  ;;  %v416_v37 = vsub.s32 2, %v2054_v59  ;;  %v1636_v41 = vpack.c.bf16 %v401_v33, %v396_v31  ;;  %v1638_v42 = vpack.c.bf16 %v173_v35, %v168_v34  ;;  %v133_v33 = vld [vmem:[#allocation5 + $0x188] sm:$0xff]  ;;  %v288_v34 = vld [vmem:[#allocation5 + $0x660] sm:$0xff] }
  0xcc   :  { %v2086_v50 = vrot.slane %v2057_v19, %v416_v37  ;;  %v348_v19 = vld [vmem:[#allocation5 + $0x840] sm:$0xff] }
  0xcd   :  { %1493 = vmatpush1.bf16.msra.mxu0 %v1492_v47  ;;  %1621 = vmatpush1.bf16.msra.mxu1 %v1620_v48  ;;  %v253_v47 = vld [vmem:[#allocation5 + $0x548] sm:$0xff]  ;;  %v178_v48 = vld [vmem:[#allocation5 + $0x2f0] sm:$0xff]  ;;  %v1678_v7 = vpack.c.bf16 %v353_v0, %v348_v19 }
  0xce   :  { %1495 = vmatprep.subr.bf16.mxu0 %v1494_v49  ;;  %1623 = vmatprep.subr.bf16.mxu1 %v1622_v53  ;;  %v183_v49 = vld [vmem:[#allocation5 + $0x318] sm:$0xff]  ;;  %v1640_v53 = vpack.c.bf16 %v93_v44, %v88_v43  ;;  %v1672_v54 = vpack.c.bf16 %v253_v47, %v248_v45  ;;  %v1688_v44 = vpack.c.bf16 %v293_v38, %v288_v34  ;;  %v313_v19 = vld [vmem:[#allocation5 + $0x728] sm:$0xff]  ;;  %v238_v0 = vld [vmem:[#allocation5 + $0x4d0] sm:$0xff] }
  0xcf   :  { %v1642_v55 = vpack.c.bf16 %v183_v49, %v178_v48  ;;  %v143_v47 = vld [vmem:[#allocation5 + $0x1d8] sm:$0xff]  ;;  %v298_v48 = vld [vmem:[#allocation5 + $0x6b0] sm:$0xff] }
  0xd0   :  { %v884_v38 = vld [vmem:[#allocation8 + $0x18] sm:$0xff] }
  0xd1   :  { %1497 = vmatpush1.bf16.msra.mxu0 %v1496_v60  ;;  %1625 = vmatpush1.bf16.msra.mxu1 %v1624_v61  ;;  %v1674_v60 = vpack.c.bf16 %v343_v52, %v338_v51  ;;  %v263_v61 = vld [vmem:[#allocation5 + $0x598] sm:$0xff]  ;;  %v228_v52 = vld [vmem:[#allocation5 + $0x480] sm:$0xff] }
  0xd2   :  { %1499 = vmatprep.subr.bf16.mxu0 %v1498_v62  ;;  %1627 = vmatprep.subr.bf16.mxu1 %v1626_v2  ;;  %v188_v62 = vld [vmem:[#allocation5 + $0x340] sm:$0xff]  ;;  %v1676_v2 = vpack.c.bf16 %v263_v61, %v258_v58  ;;  %v303_v51 = vld [vmem:[#allocation5 + $0x6d8] sm:$0xff]  ;;  %v153_v61 = vld [vmem:[#allocation5 + $0x228] sm:$0xff] }
  0xd3   :  { %v1646_v3 = vpack.c.bf16 %v193_v63, %v188_v62  ;;  %v1692_v57 = vpack.c.bf16 %v303_v51, %v298_v48  ;;  %v308_v62 = vld [vmem:[#allocation5 + $0x700] sm:$0xff]  ;;  %v886_v51 = vld [vmem:[#allocation8 + $0x28] sm:$0xff] }
  0xd4   :  { %v1696_v5 = vpack.c.bf16 %v313_v19, %v308_v62  ;;  %v888_v62 = vld [vmem:[#allocation8 + $0x38] sm:$0xff] }
  0xd5   :  { %1501 = vmatpush1.bf16.msra.mxu0 %v1500_v10  ;;  %1629 = vmatpush1.bf16.msra.mxu1 %v1628_v11  ;;  %v273_v10 = vld [vmem:[#allocation5 + $0x5e8] sm:$0xff]  ;;  %v198_v11 = vld [vmem:[#allocation5 + $0x390] sm:$0xff] }
  0xd6   :  { %1503 = vmatprep.subr.bf16.mxu0 %v1502_v12  ;;  %1631 = vmatprep.subr.bf16.mxu1 %v1630_v16  ;;  %v203_v12 = vld [vmem:[#allocation5 + $0x3b8] sm:$0xff]  ;;  %v1680_v16 = vpack.c.bf16 %v273_v10, %v268_v6 }
  0xd7   :  { %v1650_v17 = vpack.c.bf16 %v203_v12, %v198_v11  ;;  %v163_v10 = vld [vmem:[#allocation5 + $0x278] sm:$0xff]  ;;  %v318_v11 = vld [vmem:[#allocation5 + $0x750] sm:$0xff] }
  0xd8   :  { %v1700_v20 = vpack.c.bf16 %v323_v13, %v318_v11  ;;  %v890_v11 = vld [vmem:[#allocation8 + $0x48] sm:$0xff] }
  0xd9   :  { %1505 = vmatpush1.bf16.msra.mxu0 %v1504_v26  ;;  %1633 = vmatpush1.bf16.msra.mxu1 %v1632_v27  ;;  %v283_v26 = vld [vmem:[#allocation5 + $0x638] sm:$0xff]  ;;  %v208_v27 = vld [vmem:[#allocation5 + $0x3e0] sm:$0xff] }
  0xda   :  { %1507 = vmatprep.subr.bf16.mxu0 %v1506_v28  ;;  %1635 = vmatprep.subr.bf16.mxu1 %v1634_v32  ;;  %v213_v28 = vld [vmem:[#allocation5 + $0x408] sm:$0xff]  ;;  %v128_v32 = vld [vmem:[#allocation5 + $0x160] sm:$0xff] }
  0xdb   :  { %v1654_v31 = vpack.c.bf16 %v213_v28, %v208_v27  ;;  %v1656_v43 = vpack.c.bf16 %v133_v33, %v128_v32  ;;  %v913_v27 = vld [vmem:[#allocation8 + $0x100] sm:$0xff] }
  0xdd   :  { %1509 = vmatpush1.bf16.msra.mxu0 %v1508_v40  ;;  %1637 = vmatpush1.bf16.msra.mxu1 %v1636_v41  ;;  %v223_v40 = vld [vmem:[#allocation5 + $0x458] sm:$0xff]  ;;  %v378_v41 = vld [vmem:[#allocation5 + $0x930] sm:$0xff] }
  0xde   :  { %1639 = vmatprep.subr.bf16.mxu0 %v1638_v42  ;;  %1671 = vmatprep.subr.bf16.mxu1 %v1670_v46  ;;  %v383_v42 = vld [vmem:[#allocation5 + $0x958] sm:$0xff]  ;;  %v1658_v45 = vpack.c.bf16 %v223_v40, %v218_v39  ;;  %v138_v46 = vld [vmem:[#allocation5 + $0x1b0] sm:$0xff] }
  0xdf   :  { %v1690_v49 = vpack.c.bf16 %v383_v42, %v378_v41  ;;  %v1660_v56 = vpack.c.bf16 %v143_v47, %v138_v46  ;;  %v915_v39 = vld [vmem:[#allocation8 + $0x110] sm:$0xff]  ;;  %v916_v41 = vld [vmem:[#allocation8 + $0x118] sm:$0xff]  ;;  %v901_v42 = vld [vmem:[#allocation8 + $0xa0] sm:$0xff] }
  0xe0   :  { %588 = vmatmul.mubr.f32.vlgmr.msra.gmra.mrb[0].mxu0 %v2086_v50  ;;  %730 = vmatmul.mubr.f32.vlgmr.msra.gmra.mrb[0].mxu1 %v2086_v50  ;;  %v1740_v47 = vpack.c.bf16 %v916_v41, %v915_v39  ;;  %v893_v39 = vld [vmem:[#allocation8 + $0x60] sm:$0xff] }
  0xe1   :  { %1641 = vmatpush3.bf16.msra.mxu0 %v1640_v53  ;;  %1673 = vmatpush3.bf16.msra.mxu1 %v1672_v54  ;;  %v233_v53 = vld [vmem:[#allocation5 + $0x4a8] sm:$0xff]  ;;  %v388_v54 = vld [vmem:[#allocation5 + $0x980] sm:$0xff] }
  0xe2   :  { %1643 = vmatprep.subr.bf16.mxu0 %v1642_v55  ;;  %1675 = vmatprep.subr.bf16.mxu1 %v1674_v60  ;;  %v393_v55 = vld [vmem:[#allocation5 + $0x9a8] sm:$0xff]  ;;  %v1662_v58 = vpack.c.bf16 %v233_v53, %v228_v52  ;;  %v148_v60 = vld [vmem:[#allocation5 + $0x200] sm:$0xff] }
  0xe3   :  { %800 = vmatprep.mubr.f32.mxu0 %v2062_v22  ;;  %870 = vmatprep.mubr.f32.mxu1 %v2076_v36  ;;  %v373_v22 = vld [vmem:[#allocation5 + $0x908] sm:$0xff]  ;;  %v1684_v36 = vpack.c.bf16 %v283_v26, %v278_v24  ;;  %v1694_v63 = vpack.c.bf16 %v393_v55, %v388_v54  ;;  %v1664_v4 = vpack.c.bf16 %v153_v61, %v148_v60  ;;  %v903_v55 = vld [vmem:[#allocation8 + $0xb0] sm:$0xff] }
  0xe4   :  { %v1686_v35 = vpack.c.bf16 %v373_v22, %v368_v29  ;;  %v882_v26 = vld [vmem:[#allocation8 + $0x8] sm:$0xff]  ;;  %v899_v22 = vld [vmem:[#allocation8 + $0x90] sm:$0xff]  ;;  %v917_v52 = vld [vmem:[#allocation8 + $0x120] sm:$0xff] }
  0xe5   :  { %1645 = vmatpush3.bf16.msra.mxu0 %v1644_v1  ;;  %1677 = vmatpush3.bf16.msra.mxu1 %v1676_v2  ;;  %v243_v1 = vld [vmem:[#allocation5 + $0x4f8] sm:$0xff]  ;;  %v398_v2 = vld [vmem:[#allocation5 + $0x9d0] sm:$0xff]  ;;  %v925_v41 = vld [vmem:[#allocation8 + $0x160] sm:$0xff] }
  0xe6   :  { %1647 = vmatprep.subr.bf16.mxu0 %v1646_v3  ;;  %1679 = vmatprep.subr.bf16.mxu1 %v1678_v7  ;;  %v403_v3 = vld [vmem:[#allocation5 + $0x9f8] sm:$0xff]  ;;  %v1666_v6 = vpack.c.bf16 %v243_v1, %v238_v0  ;;  %v158_v7 = vld [vmem:[#allocation5 + $0x250] sm:$0xff]  ;;  %v905_v1 = vld [vmem:[#allocation8 + $0xc0] sm:$0xff] }
  0xe7   :  { %v1698_v12 = vpack.c.bf16 %v403_v3, %v398_v2  ;;  %v1668_v18 = vpack.c.bf16 %v163_v10, %v158_v7  ;;  %v914_v29 = vld [vmem:[#allocation8 + $0x108] sm:$0xff]  ;;  %v887_v61 = vld [vmem:[#allocation8 + $0x30] sm:$0xff]  ;;  %v920_v0 = vld [vmem:[#allocation8 + $0x138] sm:$0xff] }
  0xe8   :  { %v1736_v33 = vpack.c.bf16 %v914_v29, %v913_v27  ;;  %v918_v54 = vld [vmem:[#allocation8 + $0x128] sm:$0xff]  ;;  %v937_v3 = vld [vmem:[#allocation8 + $0x1c0] sm:$0xff]  ;;  %v892_v27 = vld [vmem:[#allocation8 + $0x58] sm:$0xff] }
  0xe9   :  { %1649 = vmatpush3.bf16.msra.mxu0 %v1648_v15  ;;  %1681 = vmatpush3.bf16.msra.mxu1 %v1680_v16  ;;  %v898_v15 = vld [vmem:[#allocation8 + $0x88] sm:$0xff]  ;;  %v929_v16 = vld [vmem:[#allocation8 + $0x180] sm:$0xff] }
  0xea   :  { %1651 = vmatprep.subr.bf16.mxu0 %v1650_v17  ;;  %1683 = vmatprep.subr.bf16.mxu1 %v1682_v25  ;;  %v930_v17 = vld [vmem:[#allocation8 + $0x188] sm:$0xff]  ;;  %v1702_v24 = vpack.c.bf16 %v898_v15, %v897_v14  ;;  %v881_v25 = vld [vmem:[#allocation8] sm:$0xff]  ;;  %v907_v15 = vld [vmem:[#allocation8 + $0xd0] sm:$0xff] }
  0xeb   :  { %v1734_v28 = vpack.c.bf16 %v930_v17, %v929_v16  ;;  %v1704_v32 = vpack.c.bf16 %v882_v26, %v881_v25  ;;  %v906_v2 = vld [vmem:[#allocation8 + $0xc8] sm:$0xff]  ;;  %v889_v10 = vld [vmem:[#allocation8 + $0x40] sm:$0xff]  ;;  %v908_v16 = vld [vmem:[#allocation8 + $0xd8] sm:$0xff] }
  0xec   :  { %v1718_v7 = vpack.c.bf16 %v906_v2, %v905_v1  ;;  %v922_v14 = vld [vmem:[#allocation8 + $0x148] sm:$0xff]  ;;  %v939_v17 = vld [vmem:[#allocation8 + $0x1d0] sm:$0xff]  ;;  %v1722_v25 = vpack.c.bf16 %v908_v16, %v907_v15  ;;  %v945_v2 = vld [vmem:[#allocation8 + $0x200] sm:$0xff]  ;;  %v1962_v16 = vmov 0.0  }
  0xed   :  { %1653 = vmatpush3.bf16.msra.mxu0 %v1652_v30  ;;  %1685 = vmatpush3.bf16.msra.mxu1 %v1684_v36  ;;  %v900_v30 = vld [vmem:[#allocation8 + $0x98] sm:$0xff]  ;;  %v931_v36 = vld [vmem:[#allocation8 + $0x190] sm:$0xff]  ;;  %v950_v15 = vld [vmem:[#allocation8 + $0x228] sm:$0xff] }
  0xee   :  { %1655 = vmatprep.subr.bf16.mxu0 %v1654_v31  ;;  %1687 = vmatprep.subr.bf16.mxu1 %v1686_v35  ;;  %v932_v31 = vld [vmem:[#allocation8 + $0x198] sm:$0xff]  ;;  %v1706_v34 = vpack.c.bf16 %v900_v30, %v899_v22  ;;  %v883_v35 = vld [vmem:[#allocation8 + $0x10] sm:$0xff]  ;;  %v909_v30 = vld [vmem:[#allocation8 + $0xe0] sm:$0xff] }
  0xef   :  { %v1738_v40 = vpack.c.bf16 %v932_v31, %v931_v36  ;;  %v1708_v46 = vpack.c.bf16 %v884_v38, %v883_v35  ;;  %v891_v26 = vld [vmem:[#allocation8 + $0x50] sm:$0xff]  ;;  %v924_v22 = vld [vmem:[#allocation8 + $0x158] sm:$0xff]  ;;  %v910_v36 = vld [vmem:[#allocation8 + $0xe8] sm:$0xff] }
  0xf0   :  { %v941_v31 = vld [vmem:[#allocation8 + $0x1e0] sm:$0xff]  ;;  %v1726_v35 = vpack.c.bf16 %v910_v36, %v909_v30  ;;  %v958_v36 = vld [vmem:[#allocation8 + $0x268] sm:$0xff] }
  0xf1   :  { %1657 = vmatpush3.bf16.msra.mxu0 %v1656_v43  ;;  %1689 = vmatpush3.bf16.msra.mxu1 %v1688_v44  ;;  %v902_v43 = vld [vmem:[#allocation8 + $0xa8] sm:$0xff]  ;;  %v933_v44 = vld [vmem:[#allocation8 + $0x1a0] sm:$0xff] }
  0xf2   :  { %1659 = vmatprep.subr.bf16.mxu0 %v1658_v45  ;;  %1691 = vmatprep.subr.bf16.mxu1 %v1690_v49  ;;  %v934_v45 = vld [vmem:[#allocation8 + $0x1a8] sm:$0xff]  ;;  %v1710_v48 = vpack.c.bf16 %v902_v43, %v901_v42  ;;  %v885_v49 = vld [vmem:[#allocation8 + $0x20] sm:$0xff] }
  0xf3   :  { %v1742_v53 = vpack.c.bf16 %v934_v45, %v933_v44  ;;  %v926_v43 = vld [vmem:[#allocation8 + $0x168] sm:$0xff]  ;;  %v911_v45 = vld [vmem:[#allocation8 + $0xf0] sm:$0xff]  ;;  %v957_v30 = vld [vmem:[#allocation8 + $0x260] sm:$0xff] }
  0xf4   :  { %v1760_v44 = vpack.c.bf16 %v926_v43, %v925_v41 }
  0xf5   :  { %1661 = vmatpush3.bf16.msra.mxu0 %v1660_v56  ;;  %1693 = vmatpush3.bf16.msra.mxu1 %v1692_v57  ;;  %v904_v56 = vld [vmem:[#allocation8 + $0xb8] sm:$0xff]  ;;  %v935_v57 = vld [vmem:[#allocation8 + $0x1b0] sm:$0xff] }
  0xf6   :  { %1663 = vmatprep.subr.bf16.mxu0 %v1662_v58  ;;  %1695 = vmatprep.subr.bf16.mxu1 %v1694_v63  ;;  %v1712_v58 = vpack.c.bf16 %v886_v51, %v885_v49  ;;  %v1714_v60 = vpack.c.bf16 %v904_v56, %v903_v55  ;;  %v919_v63 = vld [vmem:[#allocation8 + $0x130] sm:$0xff]  ;;  %v944_v49 = vld [vmem:[#allocation8 + $0x1f8] sm:$0xff] }
  0xf7   :  { %v895_v51 = vld [vmem:[#allocation8 + $0x70] sm:$0xff]  ;;  %v928_v56 = vld [vmem:[#allocation8 + $0x178] sm:$0xff] }
  0xf8   :  { %v927_v55 = vld [vmem:[#allocation8 + $0x170] sm:$0xff] }
  0xf9   :  { %1665 = vmatpush3.bf16.msra.mxu0 %v1664_v4  ;;  %1697 = vmatpush3.bf16.msra.mxu1 %v1696_v5  ;;  %v938_v4 = vld [vmem:[#allocation8 + $0x1c8] sm:$0xff]  ;;  %v1716_v5 = vpack.c.bf16 %v888_v62, %v887_v61 }
  0xfa   :  { %1667 = vmatprep.subr.bf16.mxu0 %v1666_v6  ;;  %1699 = vmatprep.subr.bf16.mxu1 %v1698_v12  ;;  %v1748_v6 = vpack.c.bf16 %v920_v0, %v919_v63  ;;  %v921_v12 = vld [vmem:[#allocation8 + $0x140] sm:$0xff]  ;;  %v1750_v13 = vpack.c.bf16 %v938_v4, %v937_v3  ;;  %v946_v3 = vld [vmem:[#allocation8 + $0x208] sm:$0xff] }
  0xfd   :  { %1669 = vmatpush3.bf16.msra.mxu0 %v1668_v18  ;;  %1701 = vmatpush3.bf16.msra.mxu1 %v1700_v20  ;;  %v940_v18 = vld [vmem:[#allocation8 + $0x1d8] sm:$0xff]  ;;  %v1720_v20 = vpack.c.bf16 %v890_v11, %v889_v10  ;;  %v1767_v10 = vpack.c.bf16 %v946_v3, %v945_v2 }
  0xfe   :  { %1703 = vmatprep.subr.bf16.mxu0 %v1702_v24  ;;  %1735 = vmatprep.subr.bf16.mxu1 %v1734_v28  ;;  %v1752_v24 = vpack.c.bf16 %v922_v14, %v921_v12  ;;  %v923_v28 = vld [vmem:[#allocation8 + $0x150] sm:$0xff]  ;;  %v1754_v29 = vpack.c.bf16 %v940_v18, %v939_v17  ;;  %v949_v14 = vld [vmem:[#allocation8 + $0x220] sm:$0xff] }
  0xff   :  { %v947_v12 = vld [vmem:[#allocation8 + $0x210] sm:$0xff]  ;;  %v1773_v17 = vpack.c.bf16 %v950_v15, %v949_v14 }
 0x100   :  { %801 = vmatmul.mubr.f32.vlgmr.msra.gmra.mrb[2].mxu0 %v2071_v23  ;;  %871 = vmatmul.mubr.f32.vlgmr.msra.gmra.mrb[2].mxu1 %v2086_v50  ;;  %v936_v23 = vld [vmem:[#allocation8 + $0x1b8] sm:$0xff]  ;;  %v1744_v50 = vpack.c.bf16 %v918_v54, %v917_v52  ;;  %v951_v18 = vld [vmem:[#allocation8 + $0x230] sm:$0xff] }
 0x101   :  { %1705 = vmatpush3.bf16.msra.mxu0 %v1704_v32  ;;  %1737 = vmatpush3.bf16.msra.mxu1 %v1736_v33  ;;  %v1746_v19 = vpack.c.bf16 %v936_v23, %v935_v57  ;;  %v942_v32 = vld [vmem:[#allocation8 + $0x1e8] sm:$0xff]  ;;  %v1724_v33 = vpack.c.bf16 %v892_v27, %v891_v26  ;;  %v896_v52 = vld [vmem:[#allocation8 + $0x78] sm:$0xff]  ;;  %v1764_v57 = vpack.c.bf16 %v928_v56, %v927_v55  ;;  %v1960_v23 = vmov 0.0|0.0  }
 0x102   :  { %1707 = vmatprep.subr.bf16.mxu0 %v1706_v34  ;;  %1739 = vmatprep.subr.bf16.mxu1 %v1738_v40  ;;  %v1756_v34 = vpack.c.bf16 %v924_v22, %v923_v28  ;;  %v1758_v38 = vpack.c.bf16 %v942_v32, %v941_v31  ;;  %v894_v40 = vld [vmem:[#allocation8 + $0x68] sm:$0xff]  ;;  %v1732_v54 = vpack.c.bf16 %v896_v52, %v895_v51  ;;  %v955_v28 = vld [vmem:[#allocation8 + $0x250] sm:$0xff]  ;;  %v445_v31 = vsub.s32 4, %v2054_v59 }
 0x103   :  { %v1728_v42 = vpack.c.bf16 %v894_v40, %v893_v39  ;;  %v954_v26 = vld [vmem:[#allocation8 + $0x248] sm:$0xff]  ;;  %v1785_v32 = vpack.c.bf16 %v958_v36, %v957_v30 }
 0x105   :  { %1709 = vmatpush3.bf16.msra.mxu0 %v1708_v46  ;;  %1741 = vmatpush3.bf16.msra.mxu1 %v1740_v47  ;;  %v912_v46 = vld [vmem:[#allocation8 + $0xf8] sm:$0xff]  ;;  %v943_v47 = vld [vmem:[#allocation8 + $0x1f0] sm:$0xff] }
 0x106   :  { %1711 = vmatprep.subr.bf16.mxu0 %v1710_v48  ;;  %1743 = vmatprep.subr.bf16.mxu1 %v1742_v53  ;;  %v1730_v48 = vpack.c.bf16 %v912_v46, %v911_v45  ;;  %v1762_v53 = vpack.c.bf16 %v944_v49, %v943_v47  ;;  %v961_v49 = vld [vmem:[#allocation10] sm:$0x1] }
 0x109   :  { %1713 = vmatpush3.bf16.msra.mxu0 %v1712_v58  ;;  %1745 = vmatpush3.bf16.msra.mxu1 %v1744_v50  ;;  %v404_v58 = vld [vmem:[#allocation7] sm:$0x1f] }
 0x10a   :  { %1715 = vmatprep.subr.bf16.mxu0 %v1714_v60  ;;  %1747 = vmatprep.subr.bf16.mxu1 %v1746_v19  ;;  %v430_v50 = vrot.slane %v404_v58, %v408_v9  ;;  %v438_v60 = vrot.slane %v404_v58, %v416_v37  ;;  %v434_v61 = vrot.slane %v404_v58, %v412_v8 }
 0x10b   :  { %v442_v62 = vrot.slane %v404_v58, %v420_v21 }
 0x10d   :  { %1717 = vmatpush3.bf16.msra.mxu0 %v1716_v5  ;;  %1749 = vmatpush3.bf16.msra.mxu1 %v1748_v6 }
 0x10e   :  { %1719 = vmatprep.subr.bf16.mxu0 %v1718_v7  ;;  %1751 = vmatprep.subr.bf16.mxu1 %v1750_v13  ;;  %v948_v13 = vld [vmem:[#allocation8 + $0x218] sm:$0xff] }
 0x10f   :  { %v1770_v21 = vpack.c.bf16 %v948_v13, %v947_v12 }
 0x111   :  { %1721 = vmatpush3.bf16.msra.mxu0 %v1720_v20  ;;  %1753 = vmatpush3.bf16.msra.mxu1 %v1752_v24  ;;  %v952_v20 = vld [vmem:[#allocation8 + $0x238] sm:$0xff] }
 0x112   :  { %1723 = vmatprep.subr.bf16.mxu0 %v1722_v25  ;;  %1755 = vmatprep.subr.bf16.mxu1 %v1754_v29  ;;  %v1776_v24 = vpack.c.bf16 %v952_v20, %v951_v18  ;;  %v953_v25 = vld [vmem:[#allocation8 + $0x240] sm:$0xff]  ;;  %v956_v29 = vld [vmem:[#allocation8 + $0x258] sm:$0xff] }
 0x113   :  { %v1779_v27 = vpack.c.bf16 %v954_v26, %v953_v25  ;;  %v1782_v22 = vpack.c.bf16 %v956_v29, %v955_v28 }
 0x115   :  { %1725 = vmatpush3.bf16.msra.mxu0 %v1724_v33  ;;  %1757 = vmatpush3.bf16.msra.mxu1 %v1756_v34  ;;  %v959_v33 = vld [vmem:[#allocation8 + $0x270] sm:$0xff]  ;;  %v960_v34 = vld [vmem:[#allocation8 + $0x278] sm:$0xff] }
 0x116   :  { %1727 = vmatprep.subr.bf16.mxu0 %v1726_v35  ;;  %1759 = vmatprep.subr.bf16.mxu1 %v1758_v38  ;;  %v446_v38 = vrot.slane %v404_v58, %v445_v31  ;;  %v1788_v39 = vpack.c.bf16 %v960_v34, %v959_v33 }
 0x119   :  { %1729 = vmatpush3.bf16.msra.mxu0 %v1728_v42  ;;  %1761 = vmatpush3.bf16.msra.mxu1 %v1760_v44 }
 0x11a   :  { %1731 = vmatprep.subr.bf16.mxu0 %v1730_v48  ;;  %1763 = vmatprep.subr.bf16.mxu1 %v1762_v53 }
 0x11d   :  { %1733 = vmatpush3.bf16.msra.mxu0 %v1732_v54  ;;  %1765 = vmatpush3.bf16.msra.mxu1 %v1764_v57 }
 0x11e   :  { %1766 = vmatprep.subr.bf16.mxu0 %v1960_v23 }
 0x1b3   :  { %v589_v63 = vpop.f32.mrb[0].mxu0  ;;  %v731_v0 = vpop.f32.mrb[0].mxu1 }
 0x1b4   :  { %v1790_v19 = vadd.f32 %v589_v63, %v430_v50  ;;  %v591_v1 = vpop.f32.mrb[1].mxu0  ;;  %v1792_v4 = vadd.f32 %v731_v0, %v438_v60  ;;  %v733_v6 = vpop.f32.mrb[1].mxu1 }
 0x1b5   :  { %v1791_v5 = vadd.f32 %v591_v1, %v434_v61  ;;  %v1793_v7 = vadd.f32 %v733_v6, %v442_v62 }
 0x1b6   :  { %v876_v11 = vmax.f32 %v1790_v19, 0.0  ;;  %v878_v8 = vmax.f32 %v1792_v4, 0.0 }
 0x1b7   :  { %v877_v9 = vmax.f32 %v1791_v5, 0.0  ;;  %v879_v37 = vmax.f32 %v1793_v7, 0.0 }
 0x1b9   :  { %1026 = vmatprep.mubr.f32.mxu0 %v877_v9  ;;  %1096 = vmatprep.mubr.f32.mxu1 %v879_v37 }
 0x1ba   :  { %1027 = vmatmul.mubr.f32.vlgmr.msra.gmra.mrb[4].mxu0 %v876_v11  ;;  %1097 = vmatmul.mubr.f32.vlgmr.msra.gmra.mrb[4].mxu1 %v878_v8 }
 0x1bb   :  { %1768 = vmatpush3.bf16.msra.mxu0 %v1767_v10  ;;  %1379 = vmatprep.mubr.msk.f32.mxu0 %vm1961_vm0, %v1962_v16 }
 0x1bc   :  { %1769 = vmatprep.subr.bf16.mxu0 %v1960_v23 }
 0x1bf   :  { %1771 = vmatpush3.bf16.msra.mxu0 %v1770_v21 }
 0x1c0   :  { %1772 = vmatprep.subr.bf16.mxu0 %v1960_v23 }
 0x1c3   :  { %1774 = vmatpush3.bf16.msra.mxu0 %v1773_v17 }
 0x1c4   :  { %1775 = vmatprep.subr.bf16.mxu0 %v1960_v23 }
 0x1c7   :  { %1777 = vmatpush3.bf16.msra.mxu0 %v1776_v24 }
 0x1c8   :  { %1778 = vmatprep.subr.bf16.mxu0 %v1960_v23 }
 0x1cb   :  { %1780 = vmatpush3.bf16.msra.mxu0 %v1779_v27 }
 0x1cc   :  { %1781 = vmatprep.subr.bf16.mxu0 %v1960_v23 }
 0x1cf   :  { %1783 = vmatpush3.bf16.msra.mxu0 %v1782_v22 }
 0x1d0   :  { %1784 = vmatprep.subr.bf16.mxu0 %v1960_v23 }
 0x1d3   :  { %v1222_v35 = vpop.f32.mrb[2].mxu0  ;;  %1786 = vmatpush3.bf16.msra.mxu0 %v1785_v32  ;;  %v1257_v41 = vpop.f32.mrb[2].mxu1 }
 0x1d4   :  { %v1223_v40 = vpop.f32.mrb[3].mxu0  ;;  %1787 = vmatprep.subr.bf16.mxu0 %v1960_v23  ;;  %v1258_v43 = vpop.f32.mrb[3].mxu1 }
 0x1d5   :  { %v1224_v42 = vadd.f32 %v1223_v40, %v1222_v35  ;;  %v1259_v44 = vadd.f32 %v1258_v43, %v1257_v41 }
 0x1d7   :  { %v803_v45 = vadd.f32 %v1224_v42, %v446_v38  ;;  %1789 = vmatpush3.bf16.msra.mxu0 %v1788_v39 }
 0x1d9   :  { %v873_v46 = vadd.f32 %v1259_v44, %v803_v45 }
 0x1db   :  { %v880_v59 = vmax.f32 %v873_v46, 0.0 }
 0x1dd   :  { %1380 = vmatmul.mubr.f32.vlgmr.msra.gmra.mrb[6].mxu0 %v880_v59 }
 0x28d   :  { %v1292_v47 = vpop.f32.mrb[4].mxu0  ;;  %v1327_v48 = vpop.f32.mrb[4].mxu1 }
 0x28e   :  { %v1293_v51 = vpop.f32.mrb[5].mxu0  ;;  %v1328_v53 = vpop.f32.mrb[5].mxu1 }
 0x28f   :  { %v1294_v52 = vadd.f32 %v1293_v51, %v1292_v47  ;;  %v1329_v54 = vadd.f32 %v1328_v53, %v1327_v48 }
 0x291   :  { %v1029_v55 = vadd.f32 %v1294_v52, %v961_v49 }
 0x293   :  { %v1099_v56 = vadd.f32 %v1329_v54, %v1029_v55 }
 0x2b0   :  { %v1168_v57 = vpop.f32.mrb[6].mxu0 }
 0x2b1   :  { %v1169_v23 = vadd.f32 %v1168_v57, %v1099_v56  ;;  %v1381_v58 = vpop.f32.mrb[7].mxu0 }
 0x2b3   :  { %1172 = vst [vmem:[#allocation11] sm:$0x1] %v1169_v23 }
 0x2b4   :  { %1932 = shalt.err (!%p1929_p2)
}
 0x2b5   :  { %s1933_s8 = scalar_lea.hbm %s2128_s5, 16 }
 0x2b6   :  { %p1934_p3 = scmp.ne.s32.totalorder %s2128_s5, %s1933_s8  ;;  %p1937_p4 = scmp.lt.u32.totalorder %s1933_s8, %s2128_s5 }
 0x2b8   :  { %p1939_p5 = pnand %p1937_p4, %p1934_p3 }
 0x2ba   :  { %1942 = shalt.err (!%p1939_p5)
}
 0x2bb   :  { %1182 = dma.vmem_to_hbm [thread:$0]  %s1180_s29, 16, %s2128_s5, [#allocation4]  }
 0x2bc   :  { %1949 = dma.done.wait [#allocation4], 16  }
 0x2bd   :  { %1950 = vsyncadd [#allocation4], 4294967280 }
 0x2be   :  { %1186 = vsyncpa [#allocation3], 1 }
 0x2bf   :  { %1187 = vsyncpa [#allocation6], 1 }
 0x2c0   :  { %1188 = vsyncpa [#allocation9], 1 }
 0x2c1   :  { %1189 = vsyncpa [#allocation4], 1 }

</bundles_post_ra>
